<compile_context>
chip_gen: v6e
topology: v6e:2x2x1
jax: 0.10.0
libtpu: 0.0.40
codegen_flags: <defaults>
</compile_context>

<pallas_src>
import functools

import jax
import jax.numpy as jnp
from jax.experimental import pallas as pl
from jax.experimental.pallas import tpu as pltpu

_HIGHEST = jax.lax.Precision.HIGHEST


def _se_kernel(x_ref, seg_ref, w1t_ref, w2t_ref, segt_ref, o_ref, *, inv_d):
    # x_ref:    (TB, F*D)  lane-dense tile of X (input dtype), streamed
    # seg_ref:  (F*D, F)   segment-sum matrix (1.0 where column f owns lane f*D+d)
    # w1t_ref:  (F, R)     first Linear weight, pre-transposed, f32
    # w2t_ref:  (R, F)     second Linear weight, pre-transposed, f32
    # segt_ref: (F, F*D)   broadcast matrix (seg^T), f32
    x = x_ref[...]                                                    # (TB, F*D)

    # Squeeze: per-field sum over the embedding dim via a lane-dense MXU
    # matmul, then exact mean scaling in f32 (tiny (TB, F) tensor).
    z = jnp.dot(x, seg_ref[...], precision=_HIGHEST,
                preferred_element_type=jnp.float32) * inv_d           # (TB, F)

    # Excitation MLP (bias-free): Linear -> ReLU -> Linear -> ReLU, f32.
    h = jnp.maximum(
        jnp.dot(z, w1t_ref[...], precision=_HIGHEST,
                preferred_element_type=jnp.float32), 0.0)             # (TB, R)
    a = jnp.maximum(
        jnp.dot(h, w2t_ref[...], precision=_HIGHEST,
                preferred_element_type=jnp.float32), 0.0)             # (TB, F)

    # Fold the residual "+1" into the tiny per-field tensor, then broadcast
    # the scale back to the lane-dense layout with one MXU matmul (exact:
    # segt has exactly one 1.0 per column).  out = X + X*A == X * (1 + A).
    scale = jnp.dot(1.0 + a, segt_ref[...], precision=_HIGHEST,
                    preferred_element_type=jnp.float32)               # (TB, F*D)

    o_ref[...] = (x.astype(jnp.float32) * scale).astype(o_ref.dtype)


def squeeze_excitation(x, w1, w2, *, block_rows=1024):
    """x: (B, F, D); w1: (R, F) == nn.Linear(F, R).weight; w2: (F, R)."""
    B, F, D = x.shape
    R = w1.shape[0]
    FD = F * D

    # Lane-dense 2-D view of X (free for a contiguous row-major array).
    x2d = x.reshape(B, FD)

    # Segment matrices: seg[f*D + d, f] = 1.0 ;  segt = seg^T.
    field_of_col = jnp.arange(FD, dtype=jnp.int32) // D
    seg_bool = field_of_col[:, None] == jnp.arange(F, dtype=jnp.int32)[None, :]
    seg = seg_bool.astype(x.dtype)                 # (FD, F) — matches X's dtype
    segt = seg_bool.T.astype(jnp.float32)          # (F, FD)

    # Pre-transpose the tiny Linear weights so the kernel does z @ W^T.
    w1t = jnp.transpose(w1).astype(jnp.float32)    # (F, R)
    w2t = jnp.transpose(w2).astype(jnp.float32)    # (R, F)

    # Batch tile: biggest reasonable tile (amortizes ~0.35 us/step and keeps
    # the kernel at the HBM roofline).  Partial-batch blocks must be
    # 8-aligned; a block equal to the full batch is always legal.
    tb = min(block_rows, B)
    if tb < B:
        tb = max(8, (tb // 8) * 8)
    grid = (pl.cdiv(B, tb),)

    itemsize = jnp.dtype(x.dtype).itemsize
    weight_bytes = (FD * F + F * R + R * F + F * FD) * 4
    cost = pl.CostEstimate(
        flops=(2 * B * FD * F          # x @ seg   (squeeze)
               + 2 * B * F * R         # z @ w1t
               + 2 * B * R * F         # h @ w2t
               + 2 * B * F * FD        # (1+a) @ segt  (broadcast scale)
               + B * FD),              # final re-weight multiply
        transcendentals=0,
        bytes_accessed=2 * B * FD * itemsize + weight_bytes,
    )

    kernel = functools.partial(_se_kernel, inv_d=1.0 / D)

    out2d = pl.pallas_call(
        kernel,
        out_shape=jax.ShapeDtypeStruct((B, FD), x.dtype),
        grid_spec=pltpu.PrefetchScalarGridSpec(
            num_scalar_prefetch=0,
            grid=grid,
            in_specs=[
                pl.BlockSpec((tb, FD), lambda i: (i, 0)),   # X tile (streamed)
                pl.BlockSpec((FD, F), lambda i: (0, 0)),    # seg   (resident)
                pl.BlockSpec((F, R), lambda i: (0, 0)),     # w1t   (resident)
                pl.BlockSpec((R, F), lambda i: (0, 0)),     # w2t   (resident)
                pl.BlockSpec((F, FD), lambda i: (0, 0)),    # segt  (resident)
            ],
            out_specs=pl.BlockSpec((tb, FD), lambda i: (i, 0)),
        ),
        compiler_params=pltpu.CompilerParams(
            dimension_semantics=("parallel",),
            vmem_limit_bytes=32 * 1024 * 1024,
        ),
        cost_estimate=cost,
    )(x2d, seg, w1t, w2t, segt)

    return out2d.reshape(B, F, D)


def reference(x, w1, w2):
    z = jnp.mean(x, axis=-1)
    h = jnp.maximum(jnp.dot(z, w1.T, precision=_HIGHEST), 0.0)
    a = jnp.maximum(jnp.dot(h, w2.T, precision=_HIGHEST), 0.0)
    return x + x * a[:, :, None]


if __name__ == "__main__":
    key = jax.random.PRNGKey(0)
    k_x, k_w1, k_w2 = jax.random.split(key, 3)

    # Small shapes consistent with the module's forward.
    B, FIELD, D = 8, 16, 32          # batch, field_size, embedding dim
    REDUCTION = 3                    # reduction_ratio (first Linear out-features)

    x = jax.random.normal(k_x, (B, FIELD, D), dtype=jnp.float32)
    # Deterministic parameter init (same shapes as nn.Linear weights, no bias).
    w1 = jax.random.uniform(k_w1, (REDUCTION, FIELD), dtype=jnp.float32,
                            minval=-1.0, maxval=1.0) / jnp.sqrt(FIELD)
    w2 = jax.random.uniform(k_w2, (FIELD, REDUCTION), dtype=jnp.float32,
                            minval=-1.0, maxval=1.0) / jnp.sqrt(REDUCTION)

    out = squeeze_excitation(x, w1, w2)
    jax.block_until_ready(out)

    ref = reference(x, w1, w2)
    assert out.shape == (B, FIELD, D)
    # Tolerance leaves headroom for MXU pass-decomposition / summation-order
    # differences vs. the pure-XLA reference; structural bugs are >>1e-3.
    assert jnp.allclose(out, ref, atol=1e-3, rtol=1e-3), (
        float(jnp.max(jnp.abs(out - ref))))

    print("KERNEL_OK")
</pallas_src>

<mosaic_0001>
module attributes {stable_mosaic.version = 11 : i64} {
  func.func @_se_kernel(%arg0: i32, %arg1: memref<8x512xf32, #tpu.memory_space<vmem>>, %arg2: memref<512x16xf32, #tpu.memory_space<vmem>>, %arg3: memref<16x3xf32, #tpu.memory_space<vmem>>, %arg4: memref<3x16xf32, #tpu.memory_space<vmem>>, %arg5: memref<16x512xf32, #tpu.memory_space<vmem>>, %arg6: memref<8x512xf32, #tpu.memory_space<vmem>>) attributes {dimension_semantics = [#tpu.dimension_semantics<parallel>], iteration_bounds = array<i64: 1>, scalar_prefetch = 0 : i64, scratch_operands = 0 : i64, tpu.core_type = #tpu.core_type<tc>, window_params = [{transform_indices = @transform_0, window_bounds = array<i64: 8, 512>}, {pipeline_mode = #tpu.pipeline_mode<synchronous>, transform_indices = @transform_1, window_bounds = array<i64: 512, 16>}, {pipeline_mode = #tpu.pipeline_mode<synchronous>, transform_indices = @transform_2, window_bounds = array<i64: 16, 3>}, {pipeline_mode = #tpu.pipeline_mode<synchronous>, transform_indices = @transform_3, window_bounds = array<i64: 3, 16>}, {pipeline_mode = #tpu.pipeline_mode<synchronous>, transform_indices = @transform_4, window_bounds = array<i64: 16, 512>}, {transform_indices = @transform_5, window_bounds = array<i64: 8, 512>}]} {
    %c0 = arith.constant 0 : index
    %c0_0 = arith.constant 0 : index
    %0 = vector.load %arg1[%c0, %c0_0] : memref<8x512xf32, #tpu.memory_space<vmem>>, vector<8x512xf32>
    %c0_1 = arith.constant 0 : index
    %c0_2 = arith.constant 0 : index
    %1 = vector.load %arg2[%c0_1, %c0_2] : memref<512x16xf32, #tpu.memory_space<vmem>>, vector<512x16xf32>
    %cst = arith.constant dense<0.000000e+00> : vector<8x16xf32>
    %2 = tpu.matmul %0, %1, %cst {dimension_numbers = #tpu.dot_dimension_numbers<[1], [0], [0], [1], [0, 0, 1, 1], [], []>, precision = #tpu.contract_precision<fp32>} : vector<8x512xf32>, vector<512x16xf32>, vector<8x16xf32> -> vector<8x16xf32>
    %cst_3 = arith.constant 3.125000e-02 : f32
    %3 = vector.broadcast %cst_3 : f32 to vector<8x16xf32>
    %4 = arith.mulf %2, %3 : vector<8x16xf32>
    %c0_4 = arith.constant 0 : index
    %c0_5 = arith.constant 0 : index
    %5 = vector.load %arg3[%c0_4, %c0_5] : memref<16x3xf32, #tpu.memory_space<vmem>>, vector<16x3xf32>
    %cst_6 = arith.constant dense<0.000000e+00> : vector<8x3xf32>
    %6 = tpu.matmul %4, %5, %cst_6 {dimension_numbers = #tpu.dot_dimension_numbers<[1], [0], [0], [1], [0, 0, 1, 1], [], []>, precision = #tpu.contract_precision<fp32>} : vector<8x16xf32>, vector<16x3xf32>, vector<8x3xf32> -> vector<8x3xf32>
    %cst_7 = arith.constant 0.000000e+00 : f32
    %7 = vector.broadcast %cst_7 : f32 to vector<8x3xf32>
    %8 = arith.maximumf %6, %7 : vector<8x3xf32>
    %c0_8 = arith.constant 0 : index
    %c0_9 = arith.constant 0 : index
    %9 = vector.load %arg4[%c0_8, %c0_9] : memref<3x16xf32, #tpu.memory_space<vmem>>, vector<3x16xf32>
    %cst_10 = arith.constant dense<0.000000e+00> : vector<8x16xf32>
    %10 = tpu.matmul %8, %9, %cst_10 {dimension_numbers = #tpu.dot_dimension_numbers<[1], [0], [0], [1], [0, 0, 1, 1], [], []>, precision = #tpu.contract_precision<fp32>} : vector<8x3xf32>, vector<3x16xf32>, vector<8x16xf32> -> vector<8x16xf32>
    %cst_11 = arith.constant 0.000000e+00 : f32
    %11 = vector.broadcast %cst_11 : f32 to vector<8x16xf32>
    %12 = arith.maximumf %10, %11 : vector<8x16xf32>
    %cst_12 = arith.constant 1.000000e+00 : f32
    %13 = vector.broadcast %cst_12 : f32 to vector<8x16xf32>
    %14 = arith.addf %13, %12 : vector<8x16xf32>
    %c0_13 = arith.constant 0 : index
    %c0_14 = arith.constant 0 : index
    %15 = vector.load %arg5[%c0_13, %c0_14] : memref<16x512xf32, #tpu.memory_space<vmem>>, vector<16x512xf32>
    %cst_15 = arith.constant dense<0.000000e+00> : vector<8x512xf32>
    %16 = tpu.matmul %14, %15, %cst_15 {dimension_numbers = #tpu.dot_dimension_numbers<[1], [0], [0], [1], [0, 0, 1, 1], [], []>, precision = #tpu.contract_precision<fp32>} : vector<8x16xf32>, vector<16x512xf32>, vector<8x512xf32> -> vector<8x512xf32>
    %17 = arith.mulf %0, %16 : vector<8x512xf32>
    %c0_16 = arith.constant 0 : index
    %c0_17 = arith.constant 0 : index
    %18 = vector.load %arg6[%c0_16, %c0_17] : memref<8x512xf32, #tpu.memory_space<vmem>>, vector<8x512xf32>
    tpu.vector_store %arg6[%c0_16, %c0_17], %17 {strides = array<i32>} : memref<8x512xf32, #tpu.memory_space<vmem>>, vector<8x512xf32>,
    return
  }
  func.func @transform_0(%arg0: i32) -> (i32, i32) {
    %c0_i32 = arith.constant 0 : i32
    %c0_i32_0 = arith.constant 0 : i32
    return %arg0, %c0_i32 : i32, i32
  }
  func.func @transform_1(%arg0: i32) -> (i32, i32) {
    %c0_i32 = arith.constant 0 : i32
    %c0_i32_0 = arith.constant 0 : i32
    %c0_i32_1 = arith.constant 0 : i32
    return %c0_i32, %c0_i32_0 : i32, i32
  }
  func.func @transform_2(%arg0: i32) -> (i32, i32) {
    %c0_i32 = arith.constant 0 : i32
    %c0_i32_0 = arith.constant 0 : i32
    %c0_i32_1 = arith.constant 0 : i32
    return %c0_i32, %c0_i32_0 : i32, i32
  }
  func.func @transform_3(%arg0: i32) -> (i32, i32) {
    %c0_i32 = arith.constant 0 : i32
    %c0_i32_0 = arith.constant 0 : i32
    %c0_i32_1 = arith.constant 0 : i32
    return %c0_i32, %c0_i32_0 : i32, i32
  }
  func.func @transform_4(%arg0: i32) -> (i32, i32) {
    %c0_i32 = arith.constant 0 : i32
    %c0_i32_0 = arith.constant 0 : i32
    %c0_i32_1 = arith.constant 0 : i32
    return %c0_i32, %c0_i32_0 : i32, i32
  }
  func.func @transform_5(%arg0: i32) -> (i32, i32) {
    %c0_i32 = arith.constant 0 : i32
    %c0_i32_0 = arith.constant 0 : i32
    return %arg0, %c0_i32 : i32, i32
  }
}

</mosaic_0001>

<bundles_post_ra>
// kernel: tpu_custom_call.1
= control target key start
LH: loop header
LB: loop body
LE: loop exit
PB: predicated region body
PF: predicated region fallthrough
CT: control target
= control target key end

     0   :  { %s5990_s0 = inlined_call_operand.vmem [shape: f32[8,512], index: 0, kind: input, shape index: {}]   ;;  %s5991_s1 = inlined_call_operand.vmem [shape: f32[512,16], index: 1, kind: input, shape index: {}]   ;;  %s5992_s2 = inlined_call_operand.vmem [shape: f32[16,3], index: 2, kind: input, shape index: {}]   ;;  %s5993_s3 = inlined_call_operand.vmem [shape: f32[3,16], index: 3, kind: input, shape index: {}]   ;;  %s5994_s4 = inlined_call_operand.vmem [shape: f32[16,512], index: 4, kind: input, shape index: {}]   ;;  %s5995_s5 = inlined_call_operand.hbm [shape: f32[8,512], index: 5, kind: output, shape index: {}]  }
   0x1   :  { %v56_v0 = vld [vmem:[%s5991_s1 + $0xf8] sm:$0xff]  ;;  %v55_v2 = vld [vmem:[%s5991_s1 + $0xf0] sm:$0xff]  ;;  %v54_v7 = vld [vmem:[%s5991_s1 + $0xe8] sm:$0xff] }
   0x2   :  { %v40_v1 = vld [vmem:[%s5991_s1 + $0x78] sm:$0xff]  ;;  %v4345_v3 = vand.u32 4294901760, %v56_v0  ;;  %v4349_v5 = vand.u32 4294901760, %v55_v2  ;;  %v39_v6 = vld [vmem:[%s5991_s1 + $0x70] sm:$0xff]  ;;  %v38_v8 = vld [vmem:[%s5991_s1 + $0x68] sm:$0xff]  ;;  %v4362_v10 = vand.u32 4294901760, %v54_v7 }
   0x3   :  { %v4347_v4 = vand.u32 4294901760, %v40_v1  ;;  %v4360_v9 = vand.u32 4294901760, %v39_v6  ;;  %v4364_v11 = vand.u32 4294901760, %v38_v8  ;;  %v53_v12 = vld [vmem:[%s5991_s1 + $0xe0] sm:$0xff]  ;;  %v52_v14 = vld [vmem:[%s5991_s1 + $0xd8] sm:$0xff]  ;;  %v4393_v20 = vld [vmem:[%s5991_s1 + $0xd0] sm:$0xff] }
   0x4   :  { %v37_v13 = vld [vmem:[%s5991_s1 + $0x60] sm:$0xff]  ;;  %3752 = vmatprep.subr.mxu0 %v4345_v3  ;;  %v4376_v15 = vand.u32 4294901760, %v53_v12  ;;  %v4380_v17 = vand.u32 4294901760, %v52_v14  ;;  %v4383_v18 = vsub.f32 %v56_v0, %v4345_v3  ;;  %v4388_v19 = vld [vmem:[%s5991_s1 + $0x58] sm:$0xff]  ;;  %v4398_v21 = vld [vmem:[%s5991_s1 + $0x50] sm:$0xff]  ;;  %v4408_v24 = vand.u32 4294901760, %v4393_v20 }
   0x5   :  { %v4378_v16 = vand.u32 4294901760, %v37_v13  ;;  %3753 = vmatpush3.msra.mxu0 %v4347_v4  ;;  %v4402_v22 = vand.u32 4294901760, %v4388_v19  ;;  %v4405_v23 = vsub.f32 %v40_v1, %v4347_v4  ;;  %v4411_v25 = vsub.f32 %v55_v2, %v4349_v5  ;;  %v4416_v26 = vld [vmem:[%s5991_s1 + $0xc8] sm:$0xff]  ;;  %v4426_v28 = vld [vmem:[%s5991_s1 + $0xc0] sm:$0xff]  ;;  %v4478_v46 = vld [vmem:[%s5991_s1 + $0xb8] sm:$0xff] }
   0x6   :  { %v4421_v27 = vld [vmem:[%s5991_s1 + $0x48] sm:$0xff]  ;;  %3754 = vmatprep.subr.mxu0 %v4349_v5  ;;  %v6009_v29 = vand.u32 4294901760, %v4383_v18  ;;  %v4431_v30 = vand.u32 4294901760, %v4398_v21  ;;  %v4434_v31 = vsub.f32 %v39_v6, %v4360_v9  ;;  %v4437_v32 = vand.u32 4294901760, %v4416_v26  ;;  %v4451_v37 = vld [vmem:[%s5991_s1 + $0x40] sm:$0xff]  ;;  %v4491_v51 = vld [vmem:[%s5991_s1 + $0x38] sm:$0xff] }
   0x7   :  { %3755 = vmatpush3.msra.mxu0 %v4360_v9  ;;  %v6008_v33 = vand.u32 4294901760, %v4405_v23  ;;  %v6006_v34 = vand.u32 4294901760, %v4411_v25  ;;  %v4443_v35 = vsub.f32 %v54_v7, %v4362_v10  ;;  %v4446_v36 = vand.u32 4294901760, %v4421_v27  ;;  %v4501_v56 = vld [vmem:[%s5991_s1 + $0xb0] sm:$0xff]  ;;  %v4531_v2 = vld [vmem:[%s5991_s1 + $0xa8] sm:$0xff] }
   0x8   :  { %6133 = vst [vmem:[#allocation5_spill] sm:$0xff] %v4431_v30  ;;  %6134 = vst [vmem:[#allocation6_spill] sm:$0xff] %v4437_v32  ;;  %3756 = vmatprep.subr.mxu0 %v4362_v10  ;;  %v317_v38 = vsub.f32 %v4383_v18, %v6009_v29  ;;  %v6005_v39 = vand.u32 4294901760, %v4434_v31  ;;  %v4459_v40 = vsub.f32 %v38_v8, %v4364_v11  ;;  %v4462_v41 = vand.u32 4294901760, %v4426_v28  ;;  %v4516_v61 = vld [vmem:[%s5991_s1 + $0x30] sm:$0xff] }
   0x9   :  { %6135 = vst [vmem:[#allocation7_spill] sm:$0xff] %v4446_v36  ;;  %3757 = vmatpush3.msra.mxu0 %v4364_v11  ;;  %v205_v42 = vsub.f32 %v4405_v23, %v6008_v33  ;;  %v324_v43 = vsub.f32 %v4411_v25, %v6006_v34  ;;  %v6003_v44 = vand.u32 4294901760, %v4443_v35  ;;  %v4473_v45 = vsub.f32 %v53_v12, %v4376_v15  ;;  %v4667_v33 = vld [vmem:[%s5991_s1 + $0x88] sm:$0xff] }
   0xa   :  { %6136 = vst [vmem:[#allocation8_spill] sm:$0xff] %v4462_v41  ;;  %3758 = vmatprep.subr.mxu0 %v4376_v15  ;;  %v318_v47 = vand.u32 4294901760, %v317_v38  ;;  %v212_v48 = vsub.f32 %v4434_v31, %v6005_v39  ;;  %v6001_v49 = vand.u32 4294901760, %v4459_v40  ;;  %v4486_v50 = vand.u32 4294901760, %v4451_v37 }
   0xb   :  { %3759 = vmatpush3.msra.mxu0 %v4378_v16  ;;  %v206_v52 = vand.u32 4294901760, %v205_v42  ;;  %v325_v53 = vand.u32 4294901760, %v324_v43  ;;  %v331_v54 = vsub.f32 %v4443_v35, %v6003_v44  ;;  %v6000_v55 = vand.u32 4294901760, %v4473_v45  ;;  %v4640_v44 = vld [vmem:[%s5991_s1 + $0x90] sm:$0xff] }
   0xc   :  { %6137 = vst [vmem:[#allocation9_spill] sm:$0xff] %v4486_v50  ;;  %3760 = vmatprep.subr.mxu0 %v4380_v17  ;;  %3787 = vmatprep.subr.mxu1 %v318_v47  ;;  %v213_v57 = vand.u32 4294901760, %v212_v48  ;;  %v219_v58 = vsub.f32 %v4459_v40, %v6001_v49  ;;  %v4508_v59 = vsub.f32 %v37_v13, %v4378_v16  ;;  %v4511_v60 = vand.u32 4294901760, %v4478_v46  ;;  %v4545_v13 = vld [vmem:[%s5991_s1 + $0x28] sm:$0xff]  ;;  %v4624_v49 = vld [vmem:[%s5991_s1 + $0x18] sm:$0xff] }
   0xd   :  { %3761 = vmatpush3.msra.mxu0 %v4402_v22  ;;  %3788 = vmatpush3.msra.mxu1 %v206_v52  ;;  %v332_v62 = vand.u32 4294901760, %v331_v54  ;;  %v338_v63 = vsub.f32 %v4473_v45, %v6000_v55  ;;  %v4523_v0 = vsub.f32 %v52_v14, %v4380_v17  ;;  %v4526_v1 = vand.u32 4294901760, %v4491_v51 }
   0xe   :  { %6138 = vst [vmem:[#allocation10_spill] sm:$0xff] %v4511_v60  ;;  %3762 = vmatprep.subr.mxu0 %v4408_v24  ;;  %3789 = vmatprep.subr.mxu1 %v325_v53  ;;  %v220_v6 = vand.u32 4294901760, %v219_v58  ;;  %v5998_v7 = vand.u32 4294901760, %v4508_v59  ;;  %v4537_v8 = vsub.f32 %v4388_v19, %v4402_v22  ;;  %v4540_v12 = vand.u32 4294901760, %v4501_v56 }
   0xf   :  { %6139 = vst [vmem:[#allocation11_spill] sm:$0xff] %v4526_v1  ;;  %3763 = vmatpush3.msra.mxu0 %v4431_v30  ;;  %3790 = vmatpush3.msra.mxu1 %v213_v57  ;;  %v339_v14 = vand.u32 4294901760, %v338_v63  ;;  %v5996_v38 = vand.u32 4294901760, %v4523_v0  ;;  %v4551_v42 = vsub.f32 %v4393_v20, %v4408_v24  ;;  %v4554_v19 = vand.u32 4294901760, %v4516_v61  ;;  %v4571_v20 = vld [vmem:[%s5991_s1 + $0xa0] sm:$0xff] }
  0x10   :  { %6140 = vst [vmem:[#allocation12_spill] sm:$0xff] %v4540_v12  ;;  %3764 = vmatprep.subr.mxu0 %v4437_v32  ;;  %3791 = vmatprep.subr.mxu1 %v332_v62  ;;  %v226_v43 = vsub.f32 %v4508_v59, %v5998_v7  ;;  %v5997_v47 = vand.u32 4294901760, %v4537_v8  ;;  %v4563_v48 = vsub.f32 %v4398_v21, %v4431_v30  ;;  %v4566_v52 = vand.u32 4294901760, %v4531_v2 }
  0x11   :  { %6141 = vst [vmem:[#allocation13_spill] sm:$0xff] %v4554_v19  ;;  %3765 = vmatpush3.msra.mxu0 %v4446_v36  ;;  %3792 = vmatpush3.msra.mxu1 %v220_v6  ;;  %v345_v53 = vsub.f32 %v4523_v0, %v5996_v38  ;;  %v5999_v54 = vand.u32 4294901760, %v4551_v42  ;;  %v4580_v21 = vsub.f32 %v4416_v26, %v4437_v32  ;;  %v4583_v57 = vand.u32 4294901760, %v4545_v13  ;;  %v4597_v26 = vld [vmem:[%s5991_s1 + $0x20] sm:$0xff] }
  0x12   :  { %6142 = vst [vmem:[#allocation14_spill] sm:$0xff] %v4566_v52  ;;  %3766 = vmatprep.subr.mxu0 %v4462_v41  ;;  %3793 = vmatprep.subr.mxu1 %v339_v14  ;;  %v227_v58 = vand.u32 4294901760, %v226_v43  ;;  %v233_v62 = vsub.f32 %v4537_v8, %v5997_v47  ;;  %v6002_v63 = vand.u32 4294901760, %v4563_v48  ;;  %v4592_v6 = vsub.f32 %v4421_v27, %v4446_v36  ;;  %v4610_v27 = vld [vmem:[%s5991_s1 + $0x98] sm:$0xff] }
  0x13   :  { %6143 = vst [vmem:[#allocation15_spill] sm:$0xff] %v4583_v57  ;;  %3767 = vmatpush3.msra.mxu0 %v4486_v50  ;;  %v346_v38 = vand.u32 4294901760, %v345_v53  ;;  %v352_v14 = vsub.f32 %v4551_v42, %v5999_v54  ;;  %v6004_v43 = vand.u32 4294901760, %v4580_v21  ;;  %v4605_v47 = vand.u32 4294901760, %v4571_v20 }
  0x14   :  { %3794 = vmatpush3.msra.mxu1 %v227_v58  ;;  %3768 = vmatprep.subr.mxu0 %v4511_v60  ;;  %v234_v7 = vand.u32 4294901760, %v233_v62  ;;  %v240_v53 = vsub.f32 %v4563_v48, %v6002_v63  ;;  %v6007_v54 = vand.u32 4294901760, %v4592_v6  ;;  %v4619_v55 = vsub.f32 %v4426_v28, %v4462_v41 }
  0x15   :  { %6144 = vst [vmem:[#allocation16_spill] sm:$0xff] %v4605_v47  ;;  %3795 = vmatprep.subr.mxu1 %v346_v38  ;;  %3769 = vmatpush3.msra.mxu0 %v4526_v1  ;;  %v353_v58 = vand.u32 4294901760, %v352_v14  ;;  %v359_v62 = vsub.f32 %v4580_v21, %v6004_v43  ;;  %v4631_v63 = vand.u32 4294901760, %v4597_v26  ;;  %v4635_v28 = vsub.f32 %v4451_v37, %v4486_v50  ;;  %v4653_v37 = vld [vmem:[%s5991_s1 + $0x10] sm:$0xff] }
  0x16   :  { %3796 = vmatpush3.msra.mxu1 %v234_v7  ;;  %3770 = vmatprep.subr.mxu0 %v4540_v12  ;;  %v241_v38 = vand.u32 4294901760, %v240_v53  ;;  %v247_v14 = vsub.f32 %v4592_v6, %v6007_v54  ;;  %v6010_v43 = vand.u32 4294901760, %v4619_v55  ;;  %v4648_v39 = vand.u32 4294901760, %v4610_v27 }
  0x17   :  { %6145 = vst [vmem:[#allocation17_spill] sm:$0xff] %v4631_v63  ;;  %3797 = vmatprep.subr.mxu1 %v353_v58  ;;  %3771 = vmatpush3.msra.mxu0 %v4554_v19  ;;  %v360_v7 = vand.u32 4294901760, %v359_v62  ;;  %v6013_v53 = vand.u32 4294901760, %v4635_v28  ;;  %v4659_v34 = vsub.f32 %v4478_v46, %v4511_v60  ;;  %v4662_v54 = vand.u32 4294901760, %v4624_v49 }
  0x18   :  { %3798 = vmatpush3.msra.mxu1 %v241_v38  ;;  %3772 = vmatprep.subr.mxu0 %v4566_v52  ;;  %v248_v58 = vand.u32 4294901760, %v247_v14  ;;  %v366_v62 = vsub.f32 %v4619_v55, %v6010_v43  ;;  %v4675_v46 = vsub.f32 %v4491_v51, %v4526_v1  ;;  %v4678_v29 = vand.u32 4294901760, %v4640_v44 }
  0x19   :  { %6146 = vst [vmem:[#allocation18_spill] sm:$0xff] %v4662_v54 }
  0x1a   :  { %6147 = vst [vmem:[#allocation19_spill] sm:$0xff] %v4678_v29 }
  0x1b   :  { %10 = vsyncpa [#allocation3], 0  ;;  %3799 = vmatprep.subr.mxu1 %v360_v7  ;;  %3773 = vmatpush3.msra.mxu0 %v4583_v57  ;;  %v254_v38 = vsub.f32 %v4635_v28, %v6013_v53  ;;  %v4687_v43 = vsub.f32 %v4501_v56, %v4540_v12  ;;  %v4690_v51 = vand.u32 4294901760, %v4653_v37  ;;  %v4695_v1 = vld [vmem:[%s5991_s1 + $0x8] sm:$0xff]  ;;  %v367_v7 = vand.u32 4294901760, %v366_v62  ;;  %v4709_v12 = vld [vmem:[%s5991_s1 + $0x80] sm:$0xff] }
  0x1c   :  { %3800 = vmatpush3.msra.mxu1 %v248_v58  ;;  %3774 = vmatprep.subr.mxu0 %v4605_v47  ;;  %v4701_v14 = vsub.f32 %v4516_v61, %v4554_v19  ;;  %v4704_v56 = vand.u32 4294901760, %v4667_v33  ;;  %v6151_v60 = vand.u32 4294901760, %v4659_v34  ;;  %v4718_v61 = vsub.f32 %v4531_v2, %v4566_v52  ;;  %v4735_v2 = vld [vmem:[%s5991_s1] sm:$0xff]  ;;  %s4305_s26 = smov [#allocation2]  }
  0x1d   :  { %6148 = vst [vmem:[#allocation20_spill] sm:$0xff] %v4690_v51  ;;  %3775 = vmatpush3.msra.mxu0 %v4631_v63  ;;  %v255_v58 = vand.u32 4294901760, %v254_v38  ;;  %v6030_v53 = vand.u32 4294901760, %v4687_v43  ;;  %3801 = vmatprep.subr.mxu1 %v367_v7  ;;  %v6153_v19 = vand.u32 4294901760, %v4675_v46  ;;  %v4726_v38 = vand.u32 4294901760, %v4695_v1  ;;  %v21_v41 = vld [vmem:[%s5990_s0] sm:$0xff] }
  0x1e   :  { %6149 = vst [vmem:[#allocation21_spill] sm:$0xff] %v4701_v14  ;;  %6150 = vst [vmem:[#allocation22_spill] sm:$0xff] %v4704_v56  ;;  %v373_v62 = vsub.f32 %v4659_v34, %v6151_v60  ;;  %3776 = vmatprep.subr.mxu0 %v4648_v39  ;;  %v4730_v60 = vsub.f32 %v4545_v13, %v4583_v57  ;;  %v4743_v52 = vand.u32 4294901760, %v4709_v12  ;;  %v22_v13 = vld [vmem:[%s5990_s0 + $0x8] sm:$0xff]  ;;  %vm4304_vm0 = vmmov 0   ;;  %s3744_s27 = sshll.u32 %s4305_s26, 4  ;;  %s3745_s27 = int_to_ptr.vmem [resolvable:$true] %s3744_s27 }
  0x1f   :  { %6152 = vst [vmem:[#allocation23_spill] sm:$0xff] %v4718_v61  ;;  %v261_v50 = vsub.f32 %v4675_v46, %v6153_v19  ;;  %3802 = vmatpush3.msra.mxu1 %v255_v58  ;;  %3777 = vmatpush3.msra.mxu0 %v4662_v54  ;;  %v380_v19 = vsub.f32 %v4687_v43, %v6030_v53  ;;  %v6154_v58 = vand.u32 4294901760, %v4701_v14  ;;  %vm1816_vm1 = vcmask 130048   ;;  %s4281_s6 = scalar_lea.vmem %s3745_s27, 512  ;;  %p4286_p1 = scmp.lt.s32.totalorder %s3745_s27, %s3745_s27 }
  0x20   :  { %v374_v7 = vand.u32 4294901760, %v373_v62  ;;  %3778 = vmatprep.subr.mxu0 %v4678_v29  ;;  %v4755_v53 = vsub.f32 %v4571_v20, %v4605_v47  ;;  %v4769_v36 = vsub.f32 %v4597_v26, %v4631_v63  ;;  %v4784_v26 = vand.u32 4294901760, %v21_v41  ;;  %p4282_p0 = scmp.ne.s32.totalorder %s3745_s27, %s4281_s6  ;;  %p4287_p2 = scmp.lt.s32.totalorder %s4281_s6, %s4281_s6 }
  0x21   :  { %v262_v57 = vand.u32 4294901760, %v261_v50  ;;  %v268_v62 = vsub.f32 %v4701_v14, %v6154_v58  ;;  %v381_v32 = vand.u32 4294901760, %v380_v19  ;;  %3779 = vmatpush3.msra.mxu0 %v4690_v51  ;;  %v6155_v50 = vand.u32 4294901760, %v4718_v61 }
  0x22   :  { %3803 = vmatprep.subr.mxu1 %v374_v7  ;;  %v4765_v58 = vand.u32 4294901760, %v4735_v2  ;;  %3780 = vmatprep.subr.mxu0 %v4704_v56  ;;  %v6156_v7 = vand.u32 4294901760, %v4730_v60  ;;  %v6041_v47 = vand.u32 4294901760, %v4755_v53  ;;  %v4776_v14 = vand.u32 4294901760, %v22_v13  ;;  %6158 = vst [vmem:[#allocation25_spill] sm:$0xff] %v4784_v26  ;;  %p4288_p3 = por %p4287_p2, %p4286_p1 }
  0x23   :  { %v387_v30 = vsub.f32 %v4718_v61, %v6155_v50  ;;  %3804 = vmatpush3.msra.mxu1 %v262_v57  ;;  %v269_v20 = vand.u32 4294901760, %v268_v62  ;;  %3781 = vmatpush3.msra.mxu0 %v4726_v38  ;;  %v6042_v61 = vand.u32 4294901760, %v4769_v36  ;;  %v4782_v57 = vsub.f32 %v4610_v27, %v4648_v39 }
  0x24   :  { %v275_v19 = vsub.f32 %v4730_v60, %v6156_v7  ;;  %6157 = vst [vmem:[#allocation24_spill] sm:$0xff] %v4776_v14  ;;  %3805 = vmatprep.subr.mxu1 %v381_v32  ;;  %3782 = vmatprep.subr.mxu0 %v4743_v52  ;;  %v394_v7 = vsub.f32 %v4755_v53, %v6041_v47  ;;  %vm2285_vm2 = vcmask 1042432   ;;  %vm2281_vm3 = vcmask 23552   ;;  %p4289_p4 = pnand %p4288_p3, %p4282_p0 }
  0x25   :  { %v388_v50 = vand.u32 4294901760, %v387_v30  ;;  %3806 = vmatpush3.msra.mxu1 %v269_v20  ;;  %v4791_v30 = vsub.f32 %v22_v13, %v4776_v14  ;;  %v4795_v32 = vsub.f32 %v4624_v49, %v4662_v54  ;;  %3783 = vmatpush3.msra.mxu0 %v4765_v58  ;;  %v282_v27 = vsub.f32 %v4769_v36, %v6042_v61 }
  0x26   :  { %v276_v62 = vand.u32 4294901760, %v275_v19  ;;  %v4803_v19 = vsub.f32 %v21_v41, %v4784_v26  ;;  %v4807_v13 = vsub.f32 %v4640_v44, %v4678_v29  ;;  %v395_v47 = vand.u32 4294901760, %v394_v7  ;;  %3822 = vmatprep.subr.mxu0 %v4383_v18  ;;  %426 = vmatprep.mubr.f32.mxu1 %v4776_v14 }
  0x27   :  { %3807 = vmatprep.subr.mxu1 %v388_v50  ;;  %v6047_v49 = vand.u32 4294901760, %v4791_v30  ;;  %v6050_v50 = vand.u32 4294901760, %v4795_v32  ;;  %v4814_v61 = vsub.f32 %v4653_v37, %v4690_v51  ;;  %v283_v20 = vand.u32 4294901760, %v282_v27 }
  0x28   :  { %3808 = vmatpush3.msra.mxu1 %v276_v62  ;;  %v6159_v41 = vand.u32 4294901760, %v4782_v57  ;;  %v6160_v62 = vand.u32 4294901760, %v4803_v19  ;;  %v6161_v14 = vand.u32 4294901760, %v4807_v13  ;;  %v4841_v51 = vsub.f32 %v4695_v1, %v4726_v38 }
  0x29   :  { %3809 = vmatprep.subr.mxu1 %v395_v47  ;;  %v188_v7 = vsub.f32 %v4791_v30, %v6047_v49  ;;  %v289_v37 = vsub.f32 %v4795_v32, %v6050_v50  ;;  %v6163_v29 = vand.u32 4294901760, %v4814_v61 }
  0x2a   :  { %v401_v54 = vsub.f32 %v4782_v57, %v6159_v41  ;;  %v4831_v41 = vsub.f32 %v4667_v33, %v4704_v56  ;;  %3810 = vmatpush3.msra.mxu1 %v283_v20  ;;  %v194_v47 = vsub.f32 %v4803_v19, %v6160_v62  ;;  %v408_v49 = vsub.f32 %v4807_v13, %v6161_v14 }
  0x2b   :  { %6162 = vst [vmem:[#allocation26_spill] sm:$0xff] %v4841_v51  ;;  %v189_v50 = vand.u32 4294901760, %v188_v7  ;;  %v290_v27 = vand.u32 4294901760, %v289_v37  ;;  %v296_v33 = vsub.f32 %v4814_v61, %v6163_v29  ;;  %v6057_v62 = vand.u32 4294901760, %v4841_v51 }
  0x2c   :  { %v402_v44 = vand.u32 4294901760, %v401_v54  ;;  %v6058_v54 = vand.u32 4294901760, %v4831_v41  ;;  %v195_v20 = vand.u32 4294901760, %v194_v47  ;;  %v409_v56 = vand.u32 4294901760, %v408_v49 }
  0x2d   :  { %v4850_v14 = vsub.f32 %v4709_v12, %v4743_v52  ;;  %190 = vmatprep.mubr.f32.mxu0 %v189_v50  ;;  %v297_v1 = vand.u32 4294901760, %v296_v33  ;;  %v4857_v29 = vsub.f32 %v4735_v2, %v4765_v58  ;;  %v303_v49 = vsub.f32 %v4841_v51, %v6057_v62  ;;  %v6166_v33 = vld [vmem:[#allocation21_spill] sm:$0xff]  ;;  %v6179_v62 = vld [vmem:[#allocation16_spill] sm:$0xff] }
  0x2e   :  { %3811 = vmatprep.subr.mxu1 %v402_v44  ;;  %v415_v7 = vsub.f32 %v4831_v41, %v6058_v54  ;;  %196 = vmatmul.mubr.f32.vlgmr.msra.gmra.mxu0 %v195_v20  ;;  %v6167_v20 = vld [vmem:[#allocation5_spill] sm:$0xff]  ;;  %v6180_v54 = vand.u32 4294901760, %v4383_v18  ;;  %v6188_v18 = vand.u32 4294901760, %v4443_v35 }
  0x2f   :  { %6164 = vst [vmem:[#allocation27_spill] sm:$0xff] %v4850_v14  ;;  %3812 = vmatpush3.msra.mxu1 %v290_v27  ;;  %6165 = vst [vmem:[#allocation28_spill] sm:$0xff] %v4857_v29  ;;  %v6056_v12 = vand.u32 4294901760, %v4850_v14  ;;  %3823 = vmatpush3.msra.mxu0 %v4405_v23  ;;  %v6055_v44 = vand.u32 4294901760, %v4857_v29  ;;  %v304_v37 = vand.u32 4294901760, %v303_v49  ;;  %v6170_v49 = vld [vmem:[#allocation7_spill] sm:$0xff] }
  0x30   :  { %3813 = vmatprep.subr.mxu1 %v409_v56  ;;  %v416_v50 = vand.u32 4294901760, %v415_v7  ;;  %3824 = vmatprep.subr.mxu0 %v4411_v25  ;;  %v6169_v7 = vld [vmem:[#allocation6_spill] sm:$0xff] }
  0x31   :  { %3814 = vmatpush3.msra.mxu1 %v297_v1  ;;  %v422_v2 = vsub.f32 %v4850_v14, %v6056_v12  ;;  %563 = vmatprep.mubr.f32.mxu0 %v4791_v30  ;;  %v310_v56 = vsub.f32 %v4857_v29, %v6055_v44  ;;  %v6168_v1 = vld [vmem:[#allocation23_spill] sm:$0xff]  ;;  %v6177_v44 = vld [vmem:[#allocation14_spill] sm:$0xff] }
  0x32   :  { %3825 = vmatpush3.msra.mxu0 %v4434_v31  ;;  %3815 = vmatprep.subr.mxu1 %v416_v50  ;;  %v6171_v50 = vld [vmem:[#allocation8_spill] sm:$0xff]  ;;  %v6178_v12 = vld [vmem:[#allocation15_spill] sm:$0xff] }
  0x33   :  { %3826 = vmatprep.subr.mxu0 %v4443_v35  ;;  %3816 = vmatpush3.msra.mxu1 %v304_v37  ;;  %v423_v27 = vand.u32 4294901760, %v422_v2  ;;  %v311_v47 = vand.u32 4294901760, %v310_v56  ;;  %v6172_v37 = vld [vmem:[#allocation9_spill] sm:$0xff]  ;;  %v6173_v2 = vld [vmem:[#allocation10_spill] sm:$0xff]  ;;  %v6174_v56 = vld [vmem:[#allocation11_spill] sm:$0xff]  ;;  %v6193_v35 = vand.u32 4294901760, %v4803_v19 }
  0x34   :  { %3827 = vmatpush3.msra.mxu0 %v4459_v40 }
  0x35   :  { %3817 = vmatprep.subr.mxu1 %v423_v27  ;;  %3828 = vmatprep.subr.mxu0 %v4473_v45  ;;  %v6175_v27 = vld [vmem:[#allocation12_spill] sm:$0xff] }
  0x36   :  { %3818 = vmatpush3.msra.mxu1 %v311_v47  ;;  %3829 = vmatpush3.msra.mxu0 %v4508_v59  ;;  %v6176_v47 = vld [vmem:[#allocation13_spill] sm:$0xff] }
  0x37   :  { %428 = vmatmul.mubr.f32.vlgmr.msra.gmra.mxu1 %v4784_v26  ;;  %3830 = vmatprep.subr.mxu0 %v4523_v0  ;;  %v6181_v26 = vld [vmem:[#allocation18_spill] sm:$0xff] }
  0x38   :  { %3857 = vmatprep.subr.mxu1 %v4345_v3  ;;  %3831 = vmatpush3.msra.mxu0 %v4537_v8 }
  0x39   :  { %3858 = vmatpush3.msra.mxu1 %v4347_v4  ;;  %3832 = vmatprep.subr.mxu0 %v4551_v42 }
  0x3a   :  { %3859 = vmatprep.subr.mxu1 %v4349_v5  ;;  %3833 = vmatpush3.msra.mxu0 %v4563_v48 }
  0x3b   :  { %3860 = vmatpush3.msra.mxu1 %v4360_v9  ;;  %3834 = vmatprep.subr.mxu0 %v4580_v21 }
  0x3c   :  { %3861 = vmatprep.subr.mxu1 %v4362_v10  ;;  %3835 = vmatpush3.msra.mxu0 %v4592_v6 }
  0x3d   :  { %3862 = vmatpush3.msra.mxu1 %v4364_v11  ;;  %3836 = vmatprep.subr.mxu0 %v4619_v55 }
  0x3e   :  { %3863 = vmatprep.subr.mxu1 %v4376_v15  ;;  %3837 = vmatpush3.msra.mxu0 %v4635_v28 }
  0x3f   :  { %3864 = vmatpush3.msra.mxu1 %v4378_v16  ;;  %3838 = vmatprep.subr.mxu0 %v4659_v34 }
  0x40   :  { %3865 = vmatprep.subr.mxu1 %v4380_v17  ;;  %3839 = vmatpush3.msra.mxu0 %v4675_v46 }
  0x41   :  { %3866 = vmatpush3.msra.mxu1 %v4402_v22  ;;  %3840 = vmatprep.subr.mxu0 %v4687_v43 }
  0x42   :  { %3867 = vmatprep.subr.mxu1 %v4408_v24  ;;  %3841 = vmatpush3.msra.mxu0 %v6166_v33 }
  0x43   :  { %3868 = vmatpush3.msra.mxu1 %v6167_v20  ;;  %3842 = vmatprep.subr.mxu0 %v6168_v1 }
  0x44   :  { %3869 = vmatprep.subr.mxu1 %v6169_v7  ;;  %3843 = vmatpush3.msra.mxu0 %v4730_v60 }
  0x45   :  { %3870 = vmatpush3.msra.mxu1 %v6170_v49  ;;  %3844 = vmatprep.subr.mxu0 %v4755_v53 }
  0x46   :  { %3871 = vmatprep.subr.mxu1 %v6171_v50  ;;  %3845 = vmatpush3.msra.mxu0 %v4769_v36 }
  0x47   :  { %3872 = vmatpush3.msra.mxu1 %v6172_v37  ;;  %3846 = vmatprep.subr.mxu0 %v4782_v57 }
  0x48   :  { %3873 = vmatprep.subr.mxu1 %v6173_v2  ;;  %3847 = vmatpush3.msra.mxu0 %v4795_v32 }
  0x49   :  { %3874 = vmatpush3.msra.mxu1 %v6174_v56  ;;  %3848 = vmatprep.subr.mxu0 %v4807_v13 }
  0x4a   :  { %3875 = vmatprep.subr.mxu1 %v6175_v27  ;;  %3849 = vmatpush3.msra.mxu0 %v4814_v61 }
  0x4b   :  { %3876 = vmatpush3.msra.mxu1 %v6176_v47  ;;  %3850 = vmatprep.subr.mxu0 %v4831_v41 }
  0x4c   :  { %3877 = vmatprep.subr.mxu1 %v6177_v44  ;;  %3851 = vmatpush3.msra.mxu0 %v4841_v51  ;;  %v6182_v51 = vand.u32 4294901760, %v4405_v23  ;;  %v6189_v23 = vand.u32 4294901760, %v4459_v40  ;;  %v6195_v40 = vand.u32 4294901760, %v4537_v8  ;;  %v6201_v8 = vand.u32 4294901760, %v4635_v28 }
  0x4d   :  { %3878 = vmatpush3.msra.mxu1 %v6178_v12  ;;  %3852 = vmatprep.subr.mxu0 %v4850_v14  ;;  %v6183_v12 = vld [vmem:[#allocation19_spill] sm:$0xff]  ;;  %v6187_v14 = vld [vmem:[#allocation22_spill] sm:$0xff] }
  0x4e   :  { %3879 = vmatprep.subr.mxu1 %v6179_v62  ;;  %3853 = vmatpush3.msra.mxu0 %v4857_v29  ;;  %v6184_v62 = vand.u32 4294901760, %v4411_v25  ;;  %v6185_v29 = vld [vmem:[#allocation20_spill] sm:$0xff]  ;;  %v6190_v25 = vand.u32 4294901760, %v4473_v45  ;;  %v6196_v45 = vand.u32 4294901760, %v4551_v42 }
  0x4f   :  { %3880 = vmatpush3.msra.mxu1 %v4631_v63  ;;  %566 = vmatmul.mubr.f32.vlgmr.msra.gmra.mxu0 %v4803_v19  ;;  %v6186_v63 = vand.u32 4294901760, %v4434_v31  ;;  %v6191_v31 = vand.u32 4294901760, %v4791_v30  ;;  %v6207_v30 = vand.u32 4294901760, %v6168_v1 }
  0x50   :  { %3881 = vmatprep.subr.mxu1 %v4648_v39  ;;  %3892 = vmatprep.subr.mxu0 %v6180_v54  ;;  %v6209_v54 = vand.u32 4294901760, %v4730_v60 }
  0x51   :  { %3882 = vmatpush3.msra.mxu1 %v6181_v26  ;;  %3893 = vmatpush3.msra.mxu0 %v6182_v51  ;;  %v6194_v51 = vand.u32 4294901760, %v4523_v0  ;;  %v6198_v0 = vand.u32 4294901760, %v4580_v21  ;;  %v6203_v21 = vand.u32 4294901760, %v4675_v46 }
  0x52   :  { %3883 = vmatprep.subr.mxu1 %v6183_v12  ;;  %3894 = vmatprep.subr.mxu0 %v6184_v62 }
  0x53   :  { %3884 = vmatpush3.msra.mxu1 %v6185_v29  ;;  %3895 = vmatpush3.msra.mxu0 %v6186_v63  ;;  %v6192_v63 = vand.u32 4294901760, %v4508_v59  ;;  %v6197_v59 = vand.u32 4294901760, %v4563_v48  ;;  %v70_v48 = vld [vmem:[%s5991_s1 + $0x168] sm:$0xff] }
  0x54   :  { %3885 = vmatprep.subr.mxu1 %v6187_v14  ;;  %3896 = vmatprep.subr.mxu0 %v6188_v18  ;;  %v5018_v46 = vand.u32 4294901760, %v70_v48  ;;  %v6213_v18 = vand.u32 4294901760, %v4782_v57 }
  0x55   :  { %3886 = vmatpush3.msra.mxu1 %v4726_v38  ;;  %3897 = vmatpush3.msra.mxu0 %v6189_v23  ;;  %v67_v23 = vld [vmem:[%s5991_s1 + $0x150] sm:$0xff] }
  0x56   :  { %3887 = vmatprep.subr.mxu1 %v4743_v52  ;;  %3898 = vmatprep.subr.mxu0 %v6190_v25  ;;  %6206 = vst [vmem:[#allocation21_spill] sm:$0xff] %v5018_v46  ;;  %v5052_v60 = vsub.f32 %v70_v48, %v5018_v46  ;;  %v6228_v48 = vld [vmem:[#allocation16_spill] sm:$0xff] }
  0x57   :  { %3888 = vmatpush3.msra.mxu1 %v4765_v58  ;;  %670 = vmatprep.mubr.f32.mxu1 %v6191_v31  ;;  %v6214_v31 = vand.u32 4294901760, %v4795_v32 }
  0x58   :  { %3899 = vmatpush3.msra.mxu0 %v6192_v63  ;;  %674 = vmatmul.mubr.f32.vlgmr.msra.gmra.mxu1 %v6193_v35  ;;  %v6216_v35 = vand.u32 4294901760, %v4807_v13  ;;  %v66_v13 = vld [vmem:[%s5991_s1 + $0x148] sm:$0xff] }
  0x59   :  { %3900 = vmatprep.subr.mxu0 %v6194_v51  ;;  %3927 = vmatprep.subr.mxu1 %v4345_v3  ;;  %v6199_v3 = vand.u32 4294901760, %v4592_v6  ;;  %v6205_v6 = vand.u32 4294901760, %v6166_v33  ;;  %v6210_v33 = vand.u32 4294901760, %v4755_v53  ;;  %v84_v53 = vld [vmem:[%s5991_s1 + $0x1d8] sm:$0xff] }
  0x5a   :  { %3901 = vmatpush3.msra.mxu0 %v6195_v40  ;;  %3928 = vmatpush3.msra.mxu1 %v4347_v4  ;;  %v88_v4 = vld [vmem:[%s5991_s1 + $0x1f8] sm:$0xff]  ;;  %v5089_v32 = vand.u32 4294901760, %v84_v53 }
  0x5b   :  { %3902 = vmatprep.subr.mxu0 %v6196_v45  ;;  %3929 = vmatprep.subr.mxu1 %v4349_v5  ;;  %v72_v5 = vld [vmem:[%s5991_s1 + $0x178] sm:$0xff]  ;;  %v4992_v42 = vand.u32 4294901760, %v88_v4 }
  0x5c   :  { %3903 = vmatpush3.msra.mxu0 %v6197_v59  ;;  %3930 = vmatpush3.msra.mxu1 %v4360_v9  ;;  %v6200_v9 = vand.u32 4294901760, %v4619_v55  ;;  %v4994_v55 = vand.u32 4294901760, %v72_v5  ;;  %6217 = vst [vmem:[#allocation7_spill] sm:$0xff] %v5089_v32  ;;  %v5097_v59 = vand.u32 4294901760, %v67_v23 }
  0x5d   :  { %3904 = vmatprep.subr.mxu0 %v6198_v0  ;;  %3931 = vmatprep.subr.mxu1 %v4362_v10  ;;  %v71_v10 = vld [vmem:[%s5991_s1 + $0x170] sm:$0xff]  ;;  %v5032_v19 = vsub.f32 %v88_v4, %v4992_v42  ;;  %v6221_v0 = vand.u32 4294901760, %v4831_v41  ;;  %v82_v4 = vld [vmem:[%s5991_s1 + $0x1c8] sm:$0xff] }
  0x5e   :  { %3905 = vmatpush3.msra.mxu0 %v6199_v3  ;;  %3932 = vmatpush3.msra.mxu1 %v4364_v11  ;;  %v6202_v11 = vand.u32 4294901760, %v4659_v34  ;;  %v6204_v34 = vand.u32 4294901760, %v4687_v43  ;;  %6220 = vst [vmem:[#allocation9_spill] sm:$0xff] %v5097_v59 }
  0x5f   :  { %3906 = vmatprep.subr.mxu0 %v6200_v9  ;;  %3933 = vmatprep.subr.mxu1 %v4376_v15  ;;  %v87_v15 = vld [vmem:[%s5991_s1 + $0x1f0] sm:$0xff] }
  0x60   :  { %3907 = vmatpush3.msra.mxu0 %v6201_v8  ;;  %3934 = vmatpush3.msra.mxu1 %v4378_v16  ;;  %v5005_v16 = vand.u32 4294901760, %v71_v10  ;;  %v5016_v28 = vand.u32 4294901760, %v87_v15  ;;  %v6225_v9 = vld [vmem:[#allocation15_spill] sm:$0xff] }
  0x61   :  { %3908 = vmatprep.subr.mxu0 %v6202_v11  ;;  %3935 = vmatprep.subr.mxu1 %v4380_v17  ;;  %v86_v17 = vld [vmem:[%s5991_s1 + $0x1e8] sm:$0xff]  ;;  %v6226_v11 = vld [vmem:[#allocation27_spill] sm:$0xff] }
  0x62   :  { %3909 = vmatpush3.msra.mxu0 %v6203_v21  ;;  %3936 = vmatpush3.msra.mxu1 %v4402_v22  ;;  %v69_v22 = vld [vmem:[%s5991_s1 + $0x160] sm:$0xff]  ;;  %v5029_v43 = vand.u32 4294901760, %v86_v17  ;;  %v5038_v62 = vsub.f32 %v71_v10, %v5005_v16 }
  0x63   :  { %3910 = vmatprep.subr.mxu0 %v6204_v34  ;;  %3937 = vmatprep.subr.mxu1 %v4408_v24  ;;  %v5027_v24 = vsub.f32 %v72_v5, %v4994_v55  ;;  %v5046_v1 = vand.u32 4294901760, %v69_v22  ;;  %v6223_v5 = vld [vmem:[#allocation26_spill] sm:$0xff]  ;;  %v81_v34 = vld [vmem:[%s5991_s1 + $0x1c0] sm:$0xff] }
  0x64   :  { %3911 = vmatpush3.msra.mxu0 %v6205_v6  ;;  %3938 = vmatpush3.msra.mxu1 %v6167_v20  ;;  %6208 = vst [vmem:[#allocation5_spill] sm:$0xff] %v5029_v43  ;;  %v85_v20 = vld [vmem:[%s5991_s1 + $0x1e0] sm:$0xff]  ;;  %v5072_v25 = vsub.f32 %v86_v17, %v5029_v43  ;;  %v6068_v63 = vand.u32 4294901760, %v5038_v62  ;;  %v5139_v17 = vand.u32 4294901760, %v66_v13 }
  0x65   :  { %3912 = vmatprep.subr.mxu0 %v6207_v30  ;;  %3939 = vmatprep.subr.mxu1 %v6169_v7  ;;  %6211 = vst [vmem:[#allocation23_spill] sm:$0xff] %v5046_v1  ;;  %v6212_v7 = vand.u32 4294901760, %v4769_v36  ;;  %v6071_v36 = vand.u32 4294901760, %v5032_v19  ;;  %v5077_v57 = vand.u32 4294901760, %v85_v20  ;;  %v5087_v51 = vsub.f32 %v69_v22, %v5046_v1  ;;  %v65_v6 = vld [vmem:[%s5991_s1 + $0x140] sm:$0xff] }
  0x66   :  { %3913 = vmatpush3.msra.mxu0 %v6209_v54  ;;  %3940 = vmatpush3.msra.mxu1 %v6170_v49  ;;  %v68_v49 = vld [vmem:[%s5991_s1 + $0x158] sm:$0xff]  ;;  %v6067_v41 = vand.u32 4294901760, %v5072_v25  ;;  %v5128_v10 = vsub.f32 %v5038_v62, %v6068_v63  ;;  %6229 = vst [vmem:[#allocation11_spill] sm:$0xff] %v5139_v17  ;;  %v5149_v30 = vsub.f32 %v84_v53, %v5089_v32 }
  0x67   :  { %3914 = vmatprep.subr.mxu0 %v6210_v33  ;;  %3941 = vmatprep.subr.mxu1 %v6171_v50  ;;  %v5061_v50 = vsub.f32 %v87_v15, %v5016_v28  ;;  %6215 = vst [vmem:[#allocation6_spill] sm:$0xff] %v5077_v57  ;;  %v5091_v40 = vand.u32 4294901760, %v68_v49  ;;  %v5131_v8 = vsub.f32 %v85_v20, %v5077_v57  ;;  %v6227_v15 = vand.u32 4294901760, %v6226_v11  ;;  %v6230_v54 = vld [vmem:[#allocation28_spill] sm:$0xff] }
  0x68   :  { %3915 = vmatpush3.msra.mxu0 %v6212_v7  ;;  %3942 = vmatpush3.msra.mxu1 %v6172_v37  ;;  %v6070_v37 = vand.u32 4294901760, %v5027_v24  ;;  %v6066_v22 = vand.u32 4294901760, %v5087_v51  ;;  %v6231_v33 = vand.u32 4294901760, %v6230_v54  ;;  %v6232_v20 = vld [vmem:[#allocation24_spill] sm:$0xff] }
  0x69   :  { %3916 = vmatprep.subr.mxu0 %v6213_v18  ;;  %3943 = vmatprep.subr.mxu1 %v6173_v2  ;;  %v83_v2 = vld [vmem:[%s5991_s1 + $0x1d0] sm:$0xff]  ;;  %6218 = vst [vmem:[#allocation8_spill] sm:$0xff] %v5091_v40  ;;  %v6069_v45 = vand.u32 4294901760, %v5061_v50  ;;  %v5137_v21 = vsub.f32 %v68_v49, %v5091_v40  ;;  %v5160_v49 = vsub.f32 %v67_v23, %v5097_v59  ;;  %v5162_v18 = vand.u32 4294901760, %v82_v4 }
  0x6a   :  { %3917 = vmatpush3.msra.mxu0 %v6214_v31  ;;  %3944 = vmatpush3.msra.mxu1 %v6174_v56  ;;  %v6219_v56 = vand.u32 4294901760, %v4814_v61  ;;  %v5109_v61 = vsub.f32 %v5032_v19, %v6071_v36  ;;  %v5116_v3 = vand.u32 4294901760, %v83_v2  ;;  %v6234_v31 = vld [vmem:[#allocation17_spill] sm:$0xff]  ;;  %v5176_v23 = vsub.f32 %v5072_v25, %v6067_v41  ;;  %v62_v36 = vld [vmem:[%s5991_s1 + $0x128] sm:$0xff] }
  0x6b   :  { %3918 = vmatprep.subr.mxu0 %v6216_v35  ;;  %3945 = vmatprep.subr.mxu1 %v6175_v27  ;;  %v6065_v27 = vand.u32 4294901760, %v5052_v60  ;;  %v5157_v7 = vsub.f32 %v5061_v50, %v6069_v45  ;;  %6233 = vst [vmem:[#allocation12_spill] sm:$0xff] %v5162_v18  ;;  %v6235_v35 = vld [vmem:[#allocation25_spill] sm:$0xff]  ;;  %v6072_v11 = vand.u32 4294901760, %v5131_v8  ;;  %v5203_v54 = vsub.f32 %v5087_v51, %v6066_v22  ;;  %v5217_v22 = vld [vmem:[%s5991_s1 + $0x1b0] sm:$0xff] }
  0x6c   :  { %3919 = vmatpush3.msra.mxu0 %v6219_v56  ;;  %3946 = vmatpush3.msra.mxu1 %v6176_v47  ;;  %v5114_v47 = vsub.f32 %v5027_v24, %v6070_v37  ;;  %6222 = vst [vmem:[#allocation10_spill] sm:$0xff] %v5116_v3  ;;  %v6075_v41 = vand.u32 4294901760, %v5160_v49  ;;  %v5221_v63 = vsub.f32 %v82_v4, %v5162_v18 }
  0x6d   :  { %3920 = vmatprep.subr.mxu0 %v6221_v0  ;;  %3947 = vmatprep.subr.mxu1 %v6177_v44  ;;  %v6224_v44 = vand.u32 4294901760, %v6223_v5  ;;  %v5167_v53 = vsub.f32 %v5052_v60, %v6065_v27  ;;  %v5179_v5 = vsub.f32 %v83_v2, %v5116_v3  ;;  %v64_v2 = vld [vmem:[%s5991_s1 + $0x138] sm:$0xff]  ;;  %v63_v27 = vld [vmem:[%s5991_s1 + $0x130] sm:$0xff] }
  0x6e   :  { %3948 = vmatpush3.msra.mxu1 %v6225_v9  ;;  %840 = vmatprep.mubr.f32.mxu0 %v6232_v20  ;;  %v5184_v9 = vand.u32 4294901760, %v81_v34 }
  0x6f   :  { %3921 = vmatpush3.msra.mxu0 %v6224_v44  ;;  %3949 = vmatprep.subr.mxu1 %v6228_v48  ;;  %v80_v48 = vld [vmem:[%s5991_s1 + $0x1b8] sm:$0xff]  ;;  %v6078_v37 = vand.u32 4294901760, %v5179_v5  ;;  %v61_v44 = vld [vmem:[%s5991_s1 + $0x120] sm:$0xff] }
  0x70   :  { %3922 = vmatprep.subr.mxu0 %v6227_v15  ;;  %3950 = vmatpush3.msra.mxu1 %v6234_v31  ;;  %6236 = vst [vmem:[#allocation13_spill] sm:$0xff] %v5184_v9  ;;  %v5187_v15 = vand.u32 4294901760, %v65_v6  ;;  %v6074_v31 = vand.u32 4294901760, %v5137_v21  ;;  %v5226_v45 = vand.u32 4294901760, %v80_v48 }
  0x71   :  { %3923 = vmatpush3.msra.mxu0 %v6231_v33  ;;  %3951 = vmatprep.subr.mxu1 %v4648_v39  ;;  %v5198_v39 = vsub.f32 %v66_v13, %v5139_v17  ;;  %v6073_v33 = vand.u32 4294901760, %v5149_v30  ;;  %v5244_v13 = vand.u32 4294901760, %v63_v27  ;;  %v5293_v56 = vsub.f32 %v5179_v5, %v6078_v37 }
  0x72   :  { %842 = vmatmul.mubr.f32.vlgmr.msra.gmra.mxu0 %v6235_v35  ;;  %3962 = vmatprep.subr.mxu0 %v4992_v42  ;;  %6237 = vst [vmem:[#allocation14_spill] sm:$0xff] %v5187_v15  ;;  %6239 = vst [vmem:[#allocation19_spill] sm:$0xff] %v5226_v45  ;;  %v5242_v4 = vsub.f32 %v65_v6, %v5187_v15  ;;  %v5298_v0 = vsub.f32 %v80_v48, %v5226_v45  ;;  %v6248_v37 = vand.u32 4294901760, %v5109_v61 }
  0x73   :  { %3952 = vmatpush3.msra.mxu1 %v6181_v26  ;;  %3963 = vmatpush3.msra.mxu0 %v4994_v55  ;;  %6238 = vst [vmem:[#allocation18_spill] sm:$0xff] %v5198_v39  ;;  %v1187_v26 = vand.u32 4294901760, %v5157_v7  ;;  %v5228_v7 = vand.u32 4294901760, %v64_v2  ;;  %6242 = vst [vmem:[#allocation26_spill] sm:$0xff] %v5244_v13  ;;  %v5258_v6 = vsub.f32 %v5149_v30, %v6073_v33  ;;  %v78_v33 = vld [vmem:[%s5991_s1 + $0x1a8] sm:$0xff] }
  0x74   :  { %3953 = vmatprep.subr.mxu1 %v6183_v12  ;;  %3964 = vmatprep.subr.mxu0 %v5016_v28  ;;  %6241 = vst [vmem:[#allocation22_spill] sm:$0xff] %v5242_v4  ;;  %v5247_v12 = vsub.f32 %v81_v34, %v5184_v9  ;;  %v5263_v34 = vsub.f32 %v5137_v21, %v6074_v31  ;;  %v5279_v31 = vand.u32 4294901760, %v62_v36 }
  0x75   :  { %3954 = vmatpush3.msra.mxu1 %v6185_v29  ;;  %3965 = vmatpush3.msra.mxu0 %v5005_v16  ;;  %6240 = vst [vmem:[#allocation20_spill] sm:$0xff] %v5228_v7  ;;  %v5239_v29 = vsub.f32 %v5131_v8, %v6072_v11  ;;  %v5266_v11 = vand.u32 4294901760, %v5217_v22  ;;  %v1208_v48 = vand.u32 4294901760, %v5258_v6  ;;  %v6251_v6 = vand.u32 4294901760, %v5221_v63 }
  0x76   :  { %3955 = vmatprep.subr.mxu1 %v6187_v14  ;;  %3966 = vmatprep.subr.mxu0 %v5029_v43  ;;  %6243 = vst [vmem:[#allocation15_spill] sm:$0xff] %v5247_v12  ;;  %6245 = vst [vmem:[#allocation16_spill] sm:$0xff] %v5279_v31  ;;  %v5295_v14 = vand.u32 4294901760, %v61_v44 }
  0x77   :  { %3956 = vmatpush3.msra.mxu1 %v4726_v38  ;;  %3967 = vmatpush3.msra.mxu0 %v5018_v46  ;;  %6244 = vst [vmem:[#allocation27_spill] sm:$0xff] %v5266_v11  ;;  %v5273_v38 = vsub.f32 %v5160_v49, %v6075_v41  ;;  %v5288_v41 = vsub.f32 %v64_v2, %v5228_v7  ;;  %v5313_v46 = vand.u32 4294901760, %v78_v33  ;;  %v6252_v2 = vand.u32 4294901760, %v5198_v39 }
  0x78   :  { %3957 = vmatprep.subr.mxu1 %v4743_v52  ;;  %3968 = vmatprep.subr.mxu0 %v5077_v57  ;;  %v77_v52 = vld [vmem:[%s5991_s1 + $0x1a0] sm:$0xff]  ;;  %6246 = vst [vmem:[#allocation28_spill] sm:$0xff] %v5295_v14  ;;  %v5333_v57 = vsub.f32 %v62_v36, %v5279_v31  ;;  %v5349_v36 = vsub.f32 %v61_v44, %v5295_v14 }
  0x79   :  { %3958 = vmatpush3.msra.mxu1 %v4765_v58  ;;  %944 = vmatprep.mubr.f32.mxu1 %v6232_v20  ;;  %v1201_v58 = vand.u32 4294901760, %v5239_v29  ;;  %v5304_v20 = vsub.f32 %v63_v27, %v5244_v13  ;;  %6249 = vst [vmem:[#allocation17_spill] sm:$0xff] %v5313_v46  ;;  %v60_v27 = vld [vmem:[%s5991_s1 + $0x118] sm:$0xff] }
  0x7a   :  { %3969 = vmatpush3.msra.mxu0 %v5046_v1  ;;  %946 = vmatmul.mubr.f32.vlgmr.msra.gmra.mxu1 %v6235_v35  ;;  %v1096_v1 = vand.u32 4294901760, %v5263_v34  ;;  %v5315_v35 = vand.u32 4294901760, %v77_v52  ;;  %v24_v29 = vld [vmem:[%s5990_s0 + $0x18] sm:$0xff]  ;;  %v5330_v34 = vsub.f32 %v5221_v63, %v6251_v6  ;;  %v1215_v6 = vand.u32 4294901760, %v5293_v56  ;;  %6253 = vst [vmem:[#allocation25_spill] sm:$0xff] %v5349_v36 }
  0x7b   :  { %6247 = vst [vmem:[#allocation24_spill] sm:$0xff] %v5304_v20  ;;  %3970 = vmatprep.subr.mxu0 %v5089_v32  ;;  %3997 = vmatprep.subr.mxu1 %v6248_v37  ;;  %v6250_v37 = vand.u32 4294901760, %v5114_v47  ;;  %v5338_v32 = vsub.f32 %v5198_v39, %v6252_v2  ;;  %v59_v47 = vld [vmem:[%s5991_s1 + $0x110] sm:$0xff]  ;;  %v76_v2 = vld [vmem:[%s5991_s1 + $0x198] sm:$0xff]  ;;  %v6255_v56 = vand.u32 4294901760, %v5247_v12  ;;  %v5372_v61 = vand.u32 4294901760, %v60_v27 }
  0x7c   :  { %3971 = vmatpush3.msra.mxu0 %v5091_v40  ;;  %v5357_v40 = vsub.f32 %v5217_v22, %v5266_v11  ;;  %v75_v22 = vld [vmem:[%s5991_s1 + $0x190] sm:$0xff]  ;;  %v1222_v43 = vand.u32 4294901760, %v5330_v34 }
  0x7d   :  { %3998 = vmatpush3.msra.mxu1 %v6250_v37  ;;  %v23_v37 = vld [vmem:[%s5990_s0 + $0x10] sm:$0xff]  ;;  %3972 = vmatprep.subr.mxu0 %v5116_v3  ;;  %v6254_v3 = vand.u32 4294901760, %v5128_v10  ;;  %v5365_v44 = vsub.f32 %v5247_v12, %v6255_v56  ;;  %v5383_v56 = vand.u32 4294901760, %v59_v47  ;;  %v6260_v12 = vand.u32 4294901760, %v5167_v53  ;;  %v58_v53 = vld [vmem:[%s5991_s1 + $0x108] sm:$0xff] }
  0x7e   :  { %3999 = vmatprep.subr.mxu1 %v1187_v26  ;;  %3973 = vmatpush3.msra.mxu0 %v5097_v59  ;;  %v6256_v26 = vand.u32 4294901760, %v5242_v4  ;;  %v5377_v59 = vand.u32 4294901760, %v24_v29 }
  0x7f   :  { %4000 = vmatpush3.msra.mxu1 %v6254_v3  ;;  %3974 = vmatprep.subr.mxu0 %v5162_v18  ;;  %v6258_v3 = vand.u32 4294901760, %v5176_v23  ;;  %v1110_v18 = vand.u32 4294901760, %v5338_v32  ;;  %v5395_v23 = vand.u32 4294901760, %v76_v2  ;;  %v74_v32 = vld [vmem:[%s5991_s1 + $0x188] sm:$0xff]  ;;  %v1229_v34 = vand.u32 4294901760, %v5365_v44 }
  0x80   :  { %v5370_v39 = vsub.f32 %v5242_v4, %v6256_v26  ;;  %6257 = vst [vmem:[#allocation29_spill] sm:$0xff] %v5377_v59  ;;  %v5386_v26 = vsub.f32 %v78_v33, %v5313_v46  ;;  %v5388_v4 = vand.u32 4294901760, %v23_v37  ;;  %3975 = vmatpush3.msra.mxu0 %v5139_v17  ;;  %v6261_v33 = vand.u32 4294901760, %v5298_v0  ;;  %1288 = vmatprep.mubr.f32.mxu1 %v5377_v59 }
  0x81   :  { %4001 = vmatprep.subr.mxu1 %v6258_v3  ;;  %3976 = vmatprep.subr.mxu0 %v5184_v9  ;;  %v5404_v17 = vand.u32 4294901760, %v75_v22  ;;  %v5419_v3 = vsub.f32 %v60_v27, %v5372_v61  ;;  %v5425_v9 = vsub.f32 %v24_v29, %v5377_v59  ;;  %v5432_v44 = vsub.f32 %v59_v47, %v5383_v56  ;;  %v73_v27 = vld [vmem:[%s5991_s1 + $0x180] sm:$0xff]  ;;  %v6300_v59 = vld [vmem:[#allocation26_spill] sm:$0xff] }
  0x82   :  { %6259 = vst [vmem:[#allocation30_spill] sm:$0xff] %v5388_v4  ;;  %4002 = vmatpush3.msra.mxu1 %v6260_v12  ;;  %v5402_v10 = vsub.f32 %v5298_v0, %v6261_v33  ;;  %v5411_v12 = vsub.f32 %v77_v52, %v5315_v35  ;;  %3977 = vmatpush3.msra.mxu0 %v5187_v15  ;;  %v1117_v33 = vand.u32 4294901760, %v5370_v39  ;;  %v57_v29 = vld [vmem:[%s5991_s1 + $0x100] sm:$0xff]  ;;  %v6266_v15 = vand.u32 4294901760, %v5357_v40 }
  0x83   :  { %4003 = vmatprep.subr.mxu1 %v1201_v58  ;;  %6262 = vst [vmem:[#allocation31_spill] sm:$0xff] %v5404_v17  ;;  %v6263_v58 = vand.u32 4294901760, %v5203_v54  ;;  %3978 = vmatprep.subr.mxu0 %v5226_v45  ;;  %v6264_v54 = vand.u32 4294901760, %v5288_v41  ;;  %v5452_v45 = vsub.f32 %v76_v2, %v5395_v23  ;;  %v6267_v39 = vand.u32 4294901760, %v5273_v38 }
  0x84   :  { %3979 = vmatpush3.msra.mxu0 %v5228_v7  ;;  %v5459_v7 = vand.u32 4294901760, %v58_v53  ;;  %v5465_v2 = vand.u32 4294901760, %v73_v27  ;;  %v6119_v38 = vand.u32 4294901760, %v5349_v36 }
  0x85   :  { %4004 = vmatpush3.msra.mxu1 %v6263_v58  ;;  %v1123_v52 = vsub.f32 %v5288_v41, %v6264_v54  ;;  %v5442_v58 = vsub.f32 %v23_v37, %v5388_v4  ;;  %v5448_v54 = vand.u32 4294901760, %v74_v32  ;;  %3980 = vmatprep.subr.mxu0 %v5266_v11  ;;  %v1236_v37 = vand.u32 4294901760, %v5402_v10 }
  0x86   :  { %4005 = vmatprep.subr.mxu1 %v1208_v48  ;;  %v6265_v48 = vand.u32 4294901760, %v5304_v20  ;;  %3981 = vmatpush3.msra.mxu0 %v5244_v13  ;;  %v5471_v10 = vsub.f32 %v75_v22, %v5404_v17 }
  0x87   :  { %4006 = vmatpush3.msra.mxu1 %v1096_v1  ;;  %v1242_v1 = vsub.f32 %v5357_v40, %v6266_v15  ;;  %3982 = vmatprep.subr.mxu0 %v5313_v46  ;;  %v1124_v15 = vand.u32 4294901760, %v1123_v52 }
  0x88   :  { %v1130_v47 = vsub.f32 %v5304_v20, %v6265_v48  ;;  %4007 = vmatprep.subr.mxu1 %v1215_v6  ;;  %v5467_v20 = vand.u32 4294901760, %v57_v29  ;;  %v6268_v48 = vand.u32 4294901760, %v5386_v26  ;;  %3983 = vmatpush3.msra.mxu0 %v5279_v31  ;;  %v6269_v6 = vand.u32 4294901760, %v5333_v57 }
  0x89   :  { %4008 = vmatpush3.msra.mxu1 %v6267_v39  ;;  %3984 = vmatprep.subr.mxu0 %v5315_v35  ;;  %v1243_v52 = vand.u32 4294901760, %v1242_v1  ;;  %v6270_v39 = vand.u32 4294901760, %v5411_v12 }
  0x8a   :  { %4009 = vmatprep.subr.mxu1 %v1222_v43  ;;  %v1249_v13 = vsub.f32 %v5386_v26, %v6268_v48  ;;  %v1131_v11 = vand.u32 4294901760, %v1130_v47  ;;  %v1137_v22 = vsub.f32 %v5333_v57, %v6269_v6  ;;  %v5485_v43 = vsub.f32 %v74_v32, %v5448_v54  ;;  %3985 = vmatpush3.msra.mxu0 %v5295_v14 }
  0x8b   :  { %4010 = vmatpush3.msra.mxu1 %v1110_v18  ;;  %v5489_v48 = vsub.f32 %v58_v53, %v5459_v7  ;;  %v1256_v18 = vsub.f32 %v5411_v12, %v6270_v39  ;;  %v5497_v6 = vsub.f32 %v57_v29, %v5467_v20  ;;  %v6272_v32 = vand.u32 4294901760, %v5425_v9  ;;  %3986 = vmatprep.subr.mxu0 %v5395_v23 }
  0x8c   :  { %4011 = vmatprep.subr.mxu1 %v1229_v34  ;;  %v5504_v53 = vsub.f32 %v73_v27, %v5465_v2  ;;  %v1250_v39 = vand.u32 4294901760, %v1249_v13  ;;  %v6274_v29 = vand.u32 4294901760, %v5442_v58  ;;  %3987 = vmatpush3.msra.mxu0 %v5372_v61  ;;  %v6275_v27 = vand.u32 4294901760, %v5452_v45 }
  0x8d   :  { %4012 = vmatpush3.msra.mxu1 %v1117_v33  ;;  %6271 = vst [vmem:[#allocation32_spill] sm:$0xff] %v5497_v6  ;;  %v1050_v34 = vsub.f32 %v5425_v9, %v6272_v32  ;;  %v1144_v33 = vsub.f32 %v5349_v36, %v6119_v38  ;;  %v1138_v32 = vand.u32 4294901760, %v1137_v22  ;;  %3988 = vmatprep.subr.mxu0 %v5404_v17  ;;  %v6276_v38 = vand.u32 4294901760, %v5419_v3 }
  0x8e   :  { %6273 = vst [vmem:[#allocation33_spill] sm:$0xff] %v5504_v53  ;;  %4013 = vmatprep.subr.mxu1 %v1236_v37  ;;  %v1056_v47 = vsub.f32 %v5442_v58, %v6274_v29  ;;  %v1263_v1 = vsub.f32 %v5452_v45, %v6275_v27  ;;  %v1257_v37 = vand.u32 4294901760, %v1256_v18  ;;  %3989 = vmatpush3.msra.mxu0 %v5383_v56  ;;  %v6277_v22 = vand.u32 4294901760, %v5471_v10 }
  0x8f   :  { %4014 = vmatpush3.msra.mxu1 %v1124_v15  ;;  %v1151_v29 = vsub.f32 %v5419_v3, %v6276_v38  ;;  %v1051_v15 = vand.u32 4294901760, %v1050_v34  ;;  %v6123_v13 = vand.u32 4294901760, %v5504_v53  ;;  %3990 = vmatprep.subr.mxu0 %v5448_v54  ;;  %v6278_v17 = vand.u32 4294901760, %v5432_v44 }
  0x90   :  { %4015 = vmatprep.subr.mxu1 %v1243_v52  ;;  %v1270_v27 = vsub.f32 %v5471_v10, %v6277_v22  ;;  %v1145_v52 = vand.u32 4294901760, %v1144_v33  ;;  %v1057_v18 = vand.u32 4294901760, %v1056_v47  ;;  %v6122_v46 = vand.u32 4294901760, %v5497_v6  ;;  %3991 = vmatpush3.msra.mxu0 %v5459_v7 }
  0x91   :  { %4016 = vmatpush3.msra.mxu1 %v1131_v11  ;;  %v1158_v38 = vsub.f32 %v5432_v44, %v6278_v17  ;;  %v1264_v11 = vand.u32 4294901760, %v1263_v1  ;;  %v6279_v34 = vand.u32 4294901760, %v5485_v43  ;;  %3992 = vmatprep.subr.mxu0 %v5465_v2  ;;  %v6280_v47 = vand.u32 4294901760, %v5489_v48 }
  0x92   :  { %4017 = vmatprep.subr.mxu1 %v1250_v39  ;;  %v1152_v39 = vand.u32 4294901760, %v1151_v29  ;;  %3993 = vmatpush3.msra.mxu0 %v5467_v20  ;;  %v1271_v17 = vand.u32 4294901760, %v1270_v27  ;;  %v1284_v1 = vsub.f32 %v5504_v53, %v6123_v13  ;;  %v6298_v13 = vld [vmem:[#allocation20_spill] sm:$0xff] }
  0x93   :  { %4018 = vmatpush3.msra.mxu1 %v1138_v32  ;;  %v1277_v22 = vsub.f32 %v5485_v43, %v6279_v34  ;;  %v1165_v33 = vsub.f32 %v5489_v48, %v6280_v47  ;;  %1052 = vmatprep.mubr.f32.mxu0 %v1051_v15  ;;  %v1159_v32 = vand.u32 4294901760, %v1158_v38  ;;  %v6282_v38 = vld [vmem:[#allocation18_spill] sm:$0xff]  ;;  %v6284_v34 = vld [vmem:[#allocation15_spill] sm:$0xff] }
  0x94   :  { %4019 = vmatprep.subr.mxu1 %v1257_v37  ;;  %1058 = vmatmul.mubr.f32.vlgmr.msra.gmra.mxu0 %v1057_v18  ;;  %v1172_v37 = vsub.f32 %v5497_v6, %v6122_v46  ;;  %v1285_v27 = vand.u32 4294901760, %v1284_v1  ;;  %v6281_v18 = vld [vmem:[#allocation5_spill] sm:$0xff]  ;;  %v6287_v47 = vld [vmem:[#allocation23_spill] sm:$0xff]  ;;  %v6290_v1 = vld [vmem:[#allocation10_spill] sm:$0xff] }
  0x95   :  { %4020 = vmatpush3.msra.mxu1 %v1145_v52  ;;  %4032 = vmatprep.subr.mxu0 %v5032_v19  ;;  %v1278_v29 = vand.u32 4294901760, %v1277_v22  ;;  %v1166_v15 = vand.u32 4294901760, %v1165_v33  ;;  %v6285_v22 = vld [vmem:[#allocation6_spill] sm:$0xff]  ;;  %v6288_v33 = vld [vmem:[#allocation7_spill] sm:$0xff] }
  0x96   :  { %4021 = vmatprep.subr.mxu1 %v1264_v11  ;;  %4033 = vmatpush3.msra.mxu0 %v5027_v24  ;;  %v1173_v52 = vand.u32 4294901760, %v1172_v37  ;;  %v6283_v11 = vld [vmem:[#allocation21_spill] sm:$0xff]  ;;  %v6297_v46 = vld [vmem:[#allocation19_spill] sm:$0xff] }
  0x97   :  { %4022 = vmatpush3.msra.mxu1 %v1152_v39  ;;  %4034 = vmatprep.subr.mxu0 %v5061_v50  ;;  %v6286_v39 = vld [vmem:[#allocation22_spill] sm:$0xff]  ;;  %v6292_v37 = vld [vmem:[#allocation9_spill] sm:$0xff] }
  0x98   :  { %4023 = vmatprep.subr.mxu1 %v1271_v17  ;;  %4035 = vmatpush3.msra.mxu0 %v5038_v62  ;;  %v6289_v17 = vld [vmem:[#allocation8_spill] sm:$0xff] }
  0x99   :  { %4024 = vmatpush3.msra.mxu1 %v1159_v32  ;;  %4036 = vmatprep.subr.mxu0 %v5072_v25  ;;  %v6291_v32 = vld [vmem:[#allocation24_spill] sm:$0xff] }
  0x9a   :  { %4025 = vmatprep.subr.mxu1 %v1278_v29  ;;  %4037 = vmatpush3.msra.mxu0 %v5052_v60  ;;  %v6293_v29 = vld [vmem:[#allocation12_spill] sm:$0xff] }
  0x9b   :  { %4026 = vmatpush3.msra.mxu1 %v1166_v15  ;;  %4038 = vmatprep.subr.mxu0 %v5131_v8  ;;  %v6294_v15 = vld [vmem:[#allocation11_spill] sm:$0xff] }
  0x9c   :  { %4027 = vmatprep.subr.mxu1 %v1285_v27  ;;  %4039 = vmatpush3.msra.mxu0 %v5087_v51  ;;  %v6295_v27 = vld [vmem:[#allocation13_spill] sm:$0xff] }
  0x9d   :  { %4028 = vmatpush3.msra.mxu1 %v1173_v52  ;;  %4040 = vmatprep.subr.mxu0 %v5149_v30  ;;  %v6296_v52 = vld [vmem:[#allocation14_spill] sm:$0xff] }
  0x9e   :  { %1290 = vmatmul.mubr.f32.vlgmr.msra.gmra.mxu1 %v5388_v4  ;;  %4067 = vmatprep.subr.mxu1 %v4992_v42  ;;  %v6299_v4 = vld [vmem:[#allocation27_spill] sm:$0xff] }
  0x9f   :  { %4041 = vmatpush3.msra.mxu0 %v5137_v21  ;;  %4068 = vmatpush3.msra.mxu1 %v4994_v55 }
  0xa0   :  { %4042 = vmatprep.subr.mxu0 %v5179_v5  ;;  %4069 = vmatprep.subr.mxu1 %v5016_v28 }
  0xa1   :  { %4043 = vmatpush3.msra.mxu0 %v5160_v49  ;;  %4070 = vmatpush3.msra.mxu1 %v5005_v16 }
  0xa2   :  { %4044 = vmatprep.subr.mxu0 %v5221_v63  ;;  %4071 = vmatprep.subr.mxu1 %v6281_v18 }
  0xa3   :  { %4045 = vmatpush3.msra.mxu0 %v6282_v38  ;;  %4072 = vmatpush3.msra.mxu1 %v6283_v11 }
  0xa4   :  { %4046 = vmatprep.subr.mxu0 %v6284_v34  ;;  %4073 = vmatprep.subr.mxu1 %v6285_v22 }
  0xa5   :  { %4047 = vmatpush3.msra.mxu0 %v6286_v39  ;;  %4074 = vmatpush3.msra.mxu1 %v6287_v47 }
  0xa6   :  { %4048 = vmatprep.subr.mxu0 %v5298_v0  ;;  %4075 = vmatprep.subr.mxu1 %v6288_v33 }
  0xa7   :  { %4049 = vmatpush3.msra.mxu0 %v5288_v41  ;;  %4076 = vmatpush3.msra.mxu1 %v6289_v17 }
  0xa8   :  { %4050 = vmatprep.subr.mxu0 %v5357_v40  ;;  %4077 = vmatprep.subr.mxu1 %v6290_v1 }
  0xa9   :  { %4051 = vmatpush3.msra.mxu0 %v6291_v32  ;;  %4078 = vmatpush3.msra.mxu1 %v6292_v37 }
  0xaa   :  { %4052 = vmatprep.subr.mxu0 %v5386_v26  ;;  %4079 = vmatprep.subr.mxu1 %v6293_v29 }
  0xab   :  { %4053 = vmatpush3.msra.mxu0 %v5333_v57  ;;  %4080 = vmatpush3.msra.mxu1 %v6294_v15 }
  0xac   :  { %4054 = vmatprep.subr.mxu0 %v5411_v12  ;;  %4081 = vmatprep.subr.mxu1 %v6295_v27 }
  0xad   :  { %4055 = vmatpush3.msra.mxu0 %v5349_v36  ;;  %4082 = vmatpush3.msra.mxu1 %v6296_v52  ;;  %v6301_v36 = vld [vmem:[#allocation17_spill] sm:$0xff] }
  0xae   :  { %4056 = vmatprep.subr.mxu0 %v5452_v45  ;;  %4083 = vmatprep.subr.mxu1 %v6297_v46 }
  0xaf   :  { %4057 = vmatpush3.msra.mxu0 %v5419_v3  ;;  %4084 = vmatpush3.msra.mxu1 %v6298_v13 }
  0xb0   :  { %4058 = vmatprep.subr.mxu0 %v5471_v10  ;;  %4085 = vmatprep.subr.mxu1 %v6299_v4 }
  0xb1   :  { %4059 = vmatpush3.msra.mxu0 %v5432_v44  ;;  %4086 = vmatpush3.msra.mxu1 %v6300_v59 }
  0xb2   :  { %4060 = vmatprep.subr.mxu0 %v5485_v43  ;;  %4087 = vmatprep.subr.mxu1 %v6301_v36  ;;  %v6302_v36 = vand.u32 4294901760, %v5032_v19  ;;  %v6307_v19 = vand.u32 4294901760, %v5072_v25  ;;  %v6312_v25 = vand.u32 4294901760, %v5442_v58 }
  0xb3   :  { %4061 = vmatpush3.msra.mxu0 %v5489_v48  ;;  %4088 = vmatpush3.msra.mxu1 %v5279_v31  ;;  %v6303_v31 = vand.u32 4294901760, %v5027_v24  ;;  %v6308_v24 = vand.u32 4294901760, %v5052_v60  ;;  %v6314_v60 = vand.u32 4294901760, %v5137_v21  ;;  %v6323_v21 = vand.u32 4294901760, %v5357_v40 }
  0xb4   :  { %4062 = vmatprep.subr.mxu0 %v5504_v53  ;;  %4089 = vmatprep.subr.mxu1 %v5315_v35  ;;  %v6304_v53 = vld [vmem:[#allocation31_spill] sm:$0xff]  ;;  %v6327_v40 = vand.u32 4294901760, %v5411_v12  ;;  %v6333_v12 = vand.u32 4294901760, %v5432_v44 }
  0xb5   :  { %4063 = vmatpush3.msra.mxu0 %v5497_v6  ;;  %1425 = vmatprep.mubr.f32.mxu0 %v5425_v9  ;;  %v6305_v6 = vand.u32 4294901760, %v5061_v50  ;;  %v6309_v50 = vand.u32 4294901760, %v5131_v8  ;;  %v6315_v8 = vand.u32 4294901760, %v5179_v5  ;;  %v6328_v5 = vld [vmem:[#allocation25_spill] sm:$0xff] }
  0xb6   :  { %4090 = vmatpush3.msra.mxu1 %v5295_v14  ;;  %1428 = vmatmul.mubr.f32.vlgmr.msra.gmra.mxu0 %v5442_v58  ;;  %v6306_v14 = vand.u32 4294901760, %v5038_v62  ;;  %v6310_v62 = vand.u32 4294901760, %v5425_v9  ;;  %v6329_v9 = vand.u32 4294901760, %v6328_v5  ;;  %v6335_v58 = vld [vmem:[#allocation17_spill] sm:$0xff] }
  0xb7   :  { %4091 = vmatprep.subr.mxu1 %v5395_v23  ;;  %4102 = vmatprep.subr.mxu0 %v6302_v36  ;;  %v6330_v36 = vand.u32 4294901760, %v5452_v45  ;;  %v6334_v45 = vand.u32 4294901760, %v5485_v43  ;;  %v6344_v43 = vld [vmem:[#allocation30_spill] sm:$0xff] }
  0xb8   :  { %4092 = vmatpush3.msra.mxu1 %v5372_v61  ;;  %4103 = vmatpush3.msra.mxu0 %v6303_v31  ;;  %v6311_v31 = vand.u32 4294901760, %v5087_v51  ;;  %v6316_v51 = vand.u32 4294901760, %v5160_v49  ;;  %v6324_v49 = vand.u32 4294901760, %v6291_v32 }
  0xb9   :  { %4093 = vmatprep.subr.mxu1 %v6304_v53  ;;  %4104 = vmatprep.subr.mxu0 %v6305_v6  ;;  %v6338_v6 = vld [vmem:[#allocation33_spill] sm:$0xff] }
  0xba   :  { %4094 = vmatpush3.msra.mxu1 %v5383_v56  ;;  %4105 = vmatpush3.msra.mxu0 %v6306_v14  ;;  %v6313_v14 = vand.u32 4294901760, %v5149_v30  ;;  %v6317_v30 = vand.u32 4294901760, %v5221_v63  ;;  %v6322_v63 = vand.u32 4294901760, %v5288_v41  ;;  %v6326_v41 = vand.u32 4294901760, %v5333_v57 }
  0xbb   :  { %4095 = vmatprep.subr.mxu1 %v5448_v54  ;;  %4106 = vmatprep.subr.mxu0 %v6307_v19  ;;  %v6331_v57 = vand.u32 4294901760, %v5419_v3  ;;  %v6337_v3 = vld [vmem:[#allocation16_spill] sm:$0xff] }
  0xbc   :  { %4096 = vmatpush3.msra.mxu1 %v5459_v7  ;;  %4107 = vmatpush3.msra.mxu0 %v6308_v24 }
  0xbd   :  { %4097 = vmatprep.subr.mxu1 %v5465_v2  ;;  %4108 = vmatprep.subr.mxu0 %v6309_v50 }
  0xbe   :  { %4098 = vmatpush3.msra.mxu1 %v5467_v20  ;;  %1532 = vmatprep.mubr.f32.mxu1 %v6310_v62 }
  0xbf   :  { %4109 = vmatpush3.msra.mxu0 %v6311_v31  ;;  %1536 = vmatmul.mubr.f32.vlgmr.msra.gmra.mxu1 %v6312_v25 }
  0xc0   :  { %4110 = vmatprep.subr.mxu0 %v6313_v14  ;;  %4137 = vmatprep.subr.mxu1 %v4992_v42  ;;  %v6318_v42 = vand.u32 4294901760, %v6282_v38  ;;  %v4303_v38 = vmov 0.0  }
  0xc1   :  { %4111 = vmatpush3.msra.mxu0 %v6314_v60  ;;  %4138 = vmatpush3.msra.mxu1 %v4994_v55  ;;  %v6319_v55 = vand.u32 4294901760, %v6284_v34 }
  0xc2   :  { %4112 = vmatprep.subr.mxu0 %v6315_v8  ;;  %4139 = vmatprep.subr.mxu1 %v5016_v28  ;;  %v6320_v28 = vand.u32 4294901760, %v6286_v39 }
  0xc3   :  { %4113 = vmatpush3.msra.mxu0 %v6316_v51  ;;  %4140 = vmatpush3.msra.mxu1 %v5005_v16  ;;  %v6321_v16 = vand.u32 4294901760, %v5298_v0  ;;  %v6325_v0 = vand.u32 4294901760, %v5386_v26  ;;  %v6332_v26 = vand.u32 4294901760, %v5471_v10  ;;  %v6339_v10 = vand.u32 4294901760, %v6338_v6 }
  0xc4   :  { %4114 = vmatprep.subr.mxu0 %v6317_v30  ;;  %4141 = vmatprep.subr.mxu1 %v6281_v18 }
  0xc5   :  { %4115 = vmatpush3.msra.mxu0 %v6318_v42  ;;  %4142 = vmatpush3.msra.mxu1 %v6283_v11 }
  0xc6   :  { %4116 = vmatprep.subr.mxu0 %v6319_v55  ;;  %4143 = vmatprep.subr.mxu1 %v6285_v22 }
  0xc7   :  { %4117 = vmatpush3.msra.mxu0 %v6320_v28  ;;  %4144 = vmatpush3.msra.mxu1 %v6287_v47 }
  0xc8   :  { %4118 = vmatprep.subr.mxu0 %v6321_v16  ;;  %4145 = vmatprep.subr.mxu1 %v6288_v33 }
  0xc9   :  { %4119 = vmatpush3.msra.mxu0 %v6322_v63  ;;  %4146 = vmatpush3.msra.mxu1 %v6289_v17 }
  0xca   :  { %4120 = vmatprep.subr.mxu0 %v6323_v21  ;;  %4147 = vmatprep.subr.mxu1 %v6290_v1 }
  0xcb   :  { %4121 = vmatpush3.msra.mxu0 %v6324_v49  ;;  %4148 = vmatpush3.msra.mxu1 %v6292_v37 }
  0xcc   :  { %4122 = vmatprep.subr.mxu0 %v6325_v0  ;;  %4149 = vmatprep.subr.mxu1 %v6293_v29 }
  0xcd   :  { %4123 = vmatpush3.msra.mxu0 %v6326_v41  ;;  %4150 = vmatpush3.msra.mxu1 %v6294_v15 }
  0xce   :  { %4124 = vmatprep.subr.mxu0 %v6327_v40  ;;  %4151 = vmatprep.subr.mxu1 %v6295_v27 }
  0xcf   :  { %4125 = vmatpush3.msra.mxu0 %v6329_v9  ;;  %4152 = vmatpush3.msra.mxu1 %v6296_v52 }
  0xd0   :  { %4126 = vmatprep.subr.mxu0 %v6330_v36  ;;  %4153 = vmatprep.subr.mxu1 %v6297_v46  ;;  %v6336_v46 = vand.u32 4294901760, %v5489_v48 }
  0xd1   :  { %4127 = vmatpush3.msra.mxu0 %v6331_v57  ;;  %4154 = vmatpush3.msra.mxu1 %v6298_v13  ;;  %v6342_v13 = vld [vmem:[#allocation29_spill] sm:$0xff] }
  0xd2   :  { %4128 = vmatprep.subr.mxu0 %v6332_v26  ;;  %4155 = vmatprep.subr.mxu1 %v6299_v4  ;;  %v6340_v4 = vld [vmem:[#allocation32_spill] sm:$0xff] }
  0xd3   :  { %4129 = vmatpush3.msra.mxu0 %v6333_v12  ;;  %4156 = vmatpush3.msra.mxu1 %v6300_v59  ;;  %v6341_v44 = vand.u32 4294901760, %v6340_v4  ;;  %v6343_v59 = vld [vmem:[#allocation28_spill] sm:$0xff] }
  0xd4   :  { %4130 = vmatprep.subr.mxu0 %v6334_v45  ;;  %4157 = vmatprep.subr.mxu1 %v6335_v58 }
  0xd5   :  { %4131 = vmatpush3.msra.mxu0 %v6336_v46  ;;  %4158 = vmatpush3.msra.mxu1 %v6337_v3 }
  0xd6   :  { %4132 = vmatprep.subr.mxu0 %v6339_v10  ;;  %4159 = vmatprep.subr.mxu1 %v5315_v35  ;;  %v1815_v35 = vld [vmem:[%s5992_s2 + $0x8] sm:$0xff] }
  0xd7   :  { %4133 = vmatpush3.msra.mxu0 %v6341_v44  ;;  %1702 = vmatprep.mubr.f32.mxu0 %v6342_v13 }
  0xd8   :  { %4160 = vmatpush3.msra.mxu1 %v6343_v59  ;;  %1704 = vmatmul.mubr.f32.vlgmr.msra.gmra.mxu0 %v6344_v43 }
  0xd9   :  { %4161 = vmatprep.subr.mxu1 %v5395_v23  ;;  %1806 = vmatprep.mubr.f32.mxu1 %v6342_v13  ;;  %v5724_v23 = vand.u32 4294901760, %v1815_v35 }
  0xda   :  { %4162 = vmatpush3.msra.mxu1 %v5372_v61  ;;  %v1814_v61 = vld [vmem:[%s5992_s2] sm:$0xff]  ;;  %4202 = vmatprep.subr.mxu0 %v4303_v38 }
  0xdb   :  { %4163 = vmatprep.subr.mxu1 %v6304_v53  ;;  %4203 = vmatpush3.msra.mxu0 %v5724_v23 }
  0xdc   :  { %4164 = vmatpush3.msra.mxu1 %v5383_v56  ;;  %v5730_v56 = vsub.f32 %v1815_v35, %v5724_v23  ;;  %4204 = vmatprep.subr.mxu0 %v4303_v38 }
  0xdd   :  { %4165 = vmatprep.subr.mxu1 %v5448_v54  ;;  %4206 = vmatprep.mubr.msk.f32.mxu0 %vm4304_vm0, %v4303_v38 }
  0xde   :  { %4166 = vmatpush3.msra.mxu1 %v5459_v7  ;;  %v5732_v7 = vand.u32 4294901760, %v1814_v61  ;;  %v1928_v54 = vand.u32 4294901760, %v5730_v56 }
  0xdf   :  { %4167 = vmatprep.subr.mxu1 %v5465_v2 }
  0xe0   :  { %4168 = vmatpush3.msra.mxu1 %v5467_v20  ;;  %v5736_v20 = vsub.f32 %v1814_v61, %v5732_v7  ;;  %v1929_v2 = vsub.f32 %v5730_v56, %v1928_v54  ;;  %4205 = vmatpush3.msra.mxu0 %v5732_v7 }
  0xe1   :  { %1808 = vmatmul.mubr.f32.vlgmr.msra.gmra.mxu1 %v6344_v43  ;;  %4209 = vmatprep.subr.mxu1 %v4303_v38 }
  0xe2   :  { %v1935_v48 = vand.u32 4294901760, %v5736_v20  ;;  %v1930_v53 = vand.u32 4294901760, %v1929_v2  ;;  %4213 = vmatprep.mubr.msk.f32.mxu1 %vm4304_vm0, %v4303_v38  ;;  %4216 = vmatprep.subr.mxu0 %v4303_v38 }
  0xe4   :  { %v1936_v18 = vsub.f32 %v5736_v20, %v1935_v48  ;;  %4210 = vmatpush3.msra.mxu1 %v1930_v53 }
  0xe5   :  { %4211 = vmatprep.subr.mxu1 %v4303_v38 }
  0xe6   :  { %v1937_v11 = vand.u32 4294901760, %v1936_v18 }
  0xe8   :  { %4212 = vmatpush3.msra.mxu1 %v1937_v11 }
  0xe9   :  { %4223 = vmatprep.subr.mxu1 %v4303_v38 }
  0xee   :  { %v3784_v34 = vpop.f32.mrf.mxu0 }
  0xf0   :  { %v3785_v22 = vpop.f32.mrf.mxu0 }
  0xf1   :  { %v3786_v24 = vadd.f32 %v3785_v22, %v3784_v34 }
  0xf7   :  { %v3819_v39 = vpop.f32.mrf.mxu1 }
  0xf9   :  { %v3820_v33 = vpop.f32.mrf.mxu1 }
  0xfa   :  { %v3821_v52 = vadd.f32 %v3820_v33, %v3819_v39 }
  0xfc   :  { %v430_v25 = vadd.f32 %v3821_v52, %v3786_v24 }
 0x10f   :  { %v3854_v47 = vpop.f32.mrf.mxu0 }
 0x111   :  { %v3855_v17 = vpop.f32.mrf.mxu0 }
 0x112   :  { %v3856_v50 = vadd.f32 %v3855_v17, %v3854_v47 }
 0x114   :  { %v568_v8 = vadd.f32 %v3856_v50, %v430_v25 }
 0x118   :  { %v3889_v1 = vpop.f32.mrf.mxu1 }
 0x11a   :  { %v3890_v37 = vpop.f32.mrf.mxu1 }
 0x11b   :  { %v3891_v14 = vadd.f32 %v3890_v37, %v3889_v1 }
 0x11d   :  { %v676_v42 = vadd.f32 %v3891_v14, %v568_v8 }
 0x132   :  { %v3924_v32 = vpop.f32.mrf.mxu0 }
 0x134   :  { %v3925_v29 = vpop.f32.mrf.mxu0 }
 0x135   :  { %v3926_v51 = vadd.f32 %v3925_v29, %v3924_v32 }
 0x137   :  { %v844_v63 = vadd.f32 %v3926_v51, %v676_v42  ;;  %v2742_v51 = vld [vmem:[%s5994_s4 + $0x28] sm:$0xff]  ;;  %v2741_v42 = vld [vmem:[%s5994_s4 + $0x20] sm:$0xff] }
 0x13a   :  { %v3959_v15 = vpop.f32.mrf.mxu1 }
 0x13c   :  { %v3960_v19 = vpop.f32.mrf.mxu1 }
 0x13d   :  { %v3961_v55 = vadd.f32 %v3960_v19, %v3959_v15 }
 0x13f   :  { %v948_v0 = vadd.f32 %v3961_v55, %v844_v63  ;;  %v5813_v55 = vand.u32 4294901760, %v2741_v42 }
 0x154   :  { %v3994_v27 = vpop.f32.mrf.mxu0 }
 0x156   :  { %v3995_v62 = vpop.f32.mrf.mxu0 }
 0x157   :  { %v3996_v21 = vadd.f32 %v3995_v62, %v3994_v27 }
 0x159   :  { %v1060_v5 = vadd.f32 %v3996_v21, %v948_v0  ;;  %v2737_v21 = vld [vmem:[%s5994_s4] sm:$0xff] }
 0x15a   :  { %v5830_v0 = vand.u32 4294901760, %v2737_v21 }
 0x15e   :  { %v4029_v31 = vpop.f32.mrf.mxu1 }
 0x160   :  { %v4030_v30 = vpop.f32.mrf.mxu1 }
 0x161   :  { %v4031_v41 = vadd.f32 %v4030_v30, %v4029_v31  ;;  %v5808_v30 = vand.u32 4294901760, %v2742_v51 }
 0x163   :  { %v1292_v57 = vadd.f32 %v4031_v41, %v1060_v5 }
 0x176   :  { %v4064_v60 = vpop.f32.mrf.mxu0 }
 0x178   :  { %v4065_v28 = vpop.f32.mrf.mxu0 }
 0x179   :  { %v4066_v9 = vadd.f32 %v4065_v28, %v4064_v60  ;;  %v2738_v28 = vld [vmem:[%s5994_s4 + $0x8] sm:$0xff] }
 0x17a   :  { %v5821_v63 = vand.u32 4294901760, %v2738_v28 }
 0x17b   :  { %v1430_v12 = vadd.f32 %v4066_v9, %v1292_v57  ;;  %v5840_v9 = vsub.f32 %v2737_v21, %v5830_v0 }
 0x17f   :  { %v4099_v16 = vpop.f32.mrf.mxu1 }
 0x181   :  { %v4100_v40 = vpop.f32.mrf.mxu1 }
 0x182   :  { %v4101_v26 = vadd.f32 %v4100_v40, %v4099_v16  ;;  %v5819_v16 = vsub.f32 %v2742_v51, %v5808_v30  ;;  %v5835_v40 = vsub.f32 %v2738_v28, %v5821_v63 }
 0x184   :  { %v1538_v46 = vadd.f32 %v4101_v26, %v1430_v12  ;;  %v2858_v41 = vand.u32 4294901760, %v5819_v16  ;;  %v2870_v57 = vand.u32 4294901760, %v5835_v40  ;;  %v2876_v12 = vand.u32 4294901760, %v5840_v9 }
 0x198   :  { %v4134_v49 = vpop.f32.mrf.mxu0 }
 0x19a   :  { %v4135_v36 = vpop.f32.mrf.mxu0 }
 0x19b   :  { %v4136_v45 = vadd.f32 %v4135_v36, %v4134_v49  ;;  %v5828_v49 = vsub.f32 %v2741_v42, %v5813_v55  ;;  %v2859_v36 = vsub.f32 %v5819_v16, %v2858_v41 }
 0x19d   :  { %v1706_v6 = vadd.f32 %v4136_v45, %v1538_v46  ;;  %v2864_v5 = vand.u32 4294901760, %v5828_v49  ;;  %v2860_v45 = vand.u32 4294901760, %v2859_v36 }
 0x19f   :  { %v2865_v26 = vsub.f32 %v5828_v49, %v2864_v5 }
 0x1a1   :  { %v4169_v58 = vpop.f32.mrf.mxu1  ;;  %v2866_v46 = vand.u32 4294901760, %v2865_v26 }
 0x1a3   :  { %v4170_v3 = vpop.f32.mrf.mxu1 }
 0x1a4   :  { %v4171_v10 = vadd.f32 %v4170_v3, %v4169_v58  ;;  %v2871_v58 = vsub.f32 %v5835_v40, %v2870_v57  ;;  %v2877_v3 = vsub.f32 %v5840_v9, %v2876_v12 }
 0x1a6   :  { %v1810_v4 = vadd.f32 %v4171_v10, %v1706_v6  ;;  %v2872_v6 = vand.u32 4294901760, %v2871_v58  ;;  %v2878_v10 = vand.u32 4294901760, %v2877_v3 }
 0x1a8   :  { %v1813_v44 = vmul.f32 0.03125, %v1810_v4 }
 0x1aa   :  { %v1818_v13 = vsel %vm1816_vm1, %v1813_v44, 0 }
 0x1ab   :  { %v1887_v59 = vand.u32 4294901760, %v1818_v13 }
 0x1ad   :  { %v1888_v43 = vsub.f32 %v1818_v13, %v1887_v59  ;;  %4214 = vmatmul.mubr.f32.vlgmr.msra.gmra.mxu1 %v1887_v59 }
 0x1ae   :  { %4224 = vmatpush3.msra.mxu1 %v5724_v23  ;;  %4227 = vmatprep.mubr.msk.f32.mxu1 %vm4304_vm0, %v4303_v38 }
 0x1af   :  { %4225 = vmatprep.subr.mxu1 %v4303_v38  ;;  %v1889_v35 = vand.u32 4294901760, %v1888_v43 }
 0x1b0   :  { %4226 = vmatpush3.msra.mxu1 %v5732_v7 }
 0x1b1   :  { %4228 = vmatmul.mubr.f32.vlgmr.msra.gmra.mxu1 %v1889_v35  ;;  %4237 = vmatprep.subr.mxu1 %v4303_v38  ;;  %v1890_v61 = vsub.f32 %v1888_v43, %v1889_v35 }
 0x1b2   :  { %4238 = vmatpush3.msra.mxu1 %v5724_v23  ;;  %4241 = vmatprep.mubr.msk.f32.mxu1 %vm4304_vm0, %v4303_v38  ;;  %v2280_v23 = vld [vmem:[%s5993_s3] sm:$0x7] }
 0x1b3   :  { %4239 = vmatprep.subr.mxu1 %v4303_v38  ;;  %v1891_v2 = vand.u32 4294901760, %v1890_v61 }
 0x1b4   :  { %4240 = vmatpush3.msra.mxu1 %v5732_v7 }
 0x1b5   :  { %4207 = vmatmul.mubr.f32.vlgmr.msra.gmra.mxu0 %v1891_v2  ;;  %4242 = vmatmul.mubr.f32.vlgmr.msra.gmra.mxu1 %v1887_v59 }
 0x1b6   :  { %4217 = vmatpush3.msra.mxu0 %v5730_v56  ;;  %4220 = vmatprep.mubr.msk.f32.mxu0 %vm4304_vm0, %v4303_v38  ;;  %v2287_v56 = vsel %vm2285_vm2, %v2280_v23, 0 }
 0x1b7   :  { %4218 = vmatprep.subr.mxu0 %v4303_v38  ;;  %4249 = vmatprep.subr.mxu1 %v4303_v38  ;;  %v2320_v7 = vand.u32 4294901760, %v2287_v56 }
 0x1b8   :  { %4219 = vmatpush3.msra.mxu0 %v5736_v20  ;;  %4251 = vmatprep.mubr.msk.f32.mxu1 %vm4304_vm0, %v4303_v38 }
 0x1b9   :  { %4230 = vmatprep.subr.mxu0 %v4303_v38  ;;  %4221 = vmatmul.mubr.f32.vlgmr.msra.gmra.mxu0 %v1888_v43 }
 0x1ba   :  { %4231 = vmatpush3.msra.mxu0 %v1928_v54  ;;  %4234 = vmatprep.mubr.msk.f32.mxu0 %vm4304_vm0, %v4303_v38  ;;  %v2397_v54 = vsub.f32 %v2287_v56, %v2320_v7 }
 0x1bb   :  { %4232 = vmatprep.subr.mxu0 %v4303_v38 }
 0x1bc   :  { %4233 = vmatpush3.msra.mxu0 %v1935_v48  ;;  %v2398_v53 = vand.u32 4294901760, %v2397_v54 }
 0x1bd   :  { %4235 = vmatmul.mubr.f32.vlgmr.msra.gmra.mxu0 %v1887_v59  ;;  %4244 = vmatprep.subr.mxu0 %v4303_v38 }
 0x1be   :  { %4246 = vmatprep.mubr.msk.f32.mxu0 %vm4304_vm0, %v4303_v38  ;;  %4245 = vmatpush3.msra.mxu0 %v2320_v7  ;;  %v2399_v20 = vsub.f32 %v2397_v54, %v2398_v53 }
 0x1bf   :  { %4254 = vmatprep.subr.mxu0 %v4303_v38 }
 0x1c0   :  { %v2400_v48 = vand.u32 4294901760, %v2399_v20 }
 0x1c2   :  { %4250 = vmatpush3.msra.mxu1 %v2400_v48  ;;  %v2743_v48 = vld [vmem:[%s5994_s4 + $0x30] sm:$0xff] }
 0x1c3   :  { %4259 = vmatprep.subr.mxu1 %v4303_v38 }
 0x26d   :  { %v1974_v18 = vpop.f32.mrf.mxu1 }
 0x26f   :  { %v4215_v11 = vpop.f32.mrf.mxu1 }
 0x270   :  { %v2740_v11 = vld [vmem:[%s5994_s4 + $0x18] sm:$0xff] }
 0x271   :  { %v2125_v34 = vpop.f32.mrf.mxu1 }
 0x273   :  { %v4229_v22 = vpop.f32.mrf.mxu1 }
 0x275   :  { %v1893_v39 = vpop.f32.mrf.mxu0  ;;  %v2275_v47 = vpop.f32.mrf.mxu1 }
 0x276   :  { %v1975_v1 = vadd.f32 %v1974_v18, %v1893_v39 }
 0x277   :  { %v4208_v33 = vpop.f32.mrf.mxu0  ;;  %v4243_v17 = vpop.f32.mrf.mxu1 }
 0x278   :  { %v2739_v33 = vld [vmem:[%s5994_s4 + $0x10] sm:$0xff] }
 0x279   :  { %v2050_v32 = vpop.f32.mrf.mxu0 }
 0x27a   :  { %v2051_v37 = vadd.f32 %v2050_v32, %v1975_v1  ;;  %v5875_v1 = vand.u32 4294901760, %v2740_v11 }
 0x27b   :  { %v4222_v29 = vpop.f32.mrf.mxu0 }
 0x27c   :  { %v2126_v15 = vadd.f32 %v2125_v34, %v2051_v37  ;;  %v5880_v29 = vand.u32 4294901760, %v2739_v33 }
 0x27d   :  { %v2202_v27 = vpop.f32.mrf.mxu0 }
 0x27e   :  { %v2203_v52 = vadd.f32 %v2202_v27, %v2126_v15 }
 0x27f   :  { %v4236_v19 = vpop.f32.mrf.mxu0 }
 0x280   :  { %v2276_v24 = vadd.f32 %v2275_v47, %v2203_v52  ;;  %v5870_v47 = vand.u32 4294901760, %v2743_v48  ;;  %v5886_v52 = vsub.f32 %v2740_v11, %v5875_v1 }
 0x282   :  { %v2279_v50 = vmax.f32 %v2276_v24, 0.0  ;;  %v5883_v15 = vsub.f32 %v2743_v48, %v5870_v47 }
 0x284   :  { %v2283_v62 = vsel %vm2281_vm3, %v2279_v50, 0  ;;  %v5891_v50 = vsub.f32 %v2739_v33, %v5880_v29 }
 0x285   :  { %v2355_v31 = vand.u32 4294901760, %v2283_v62 }
 0x287   :  { %v2356_v25 = vsub.f32 %v2283_v62, %v2355_v31  ;;  %4252 = vmatmul.mubr.f32.vlgmr.msra.gmra.mxu1 %v2355_v31 }
 0x288   :  { %4260 = vmatpush3.msra.mxu1 %v2320_v7  ;;  %4261 = vmatprep.mubr.msk.f32.mxu1 %vm4304_vm0, %v4303_v38 }
 0x289   :  { %v2357_v14 = vand.u32 4294901760, %v2356_v25  ;;  %4269 = vmatprep.subr.mxu1 %v4303_v38 }
 0x28b   :  { %4262 = vmatmul.mubr.f32.vlgmr.msra.gmra.mxu1 %v2357_v14  ;;  %v2358_v60 = vsub.f32 %v2356_v25, %v2357_v14 }
 0x28c   :  { %4270 = vmatpush3.msra.mxu1 %v2320_v7  ;;  %4271 = vmatprep.mubr.msk.f32.mxu1 %vm4304_vm0, %v4303_v38 }
 0x28d   :  { %v2359_v8 = vand.u32 4294901760, %v2358_v60  ;;  %2861 = vmatprep.subr.mxu1 %v2860_v45 }
 0x28f   :  { %4247 = vmatmul.mubr.f32.vlgmr.msra.gmra.mxu0 %v2359_v8  ;;  %4272 = vmatmul.mubr.f32.vlgmr.msra.gmra.mxu1 %v2355_v31  ;;  %v3367_v8 = vand.u32 4294901760, %v5891_v50 }
 0x290   :  { %4255 = vmatpush3.msra.mxu0 %v2397_v54  ;;  %4256 = vmatprep.mubr.msk.f32.mxu0 %vm4304_vm0, %v4303_v38 }
 0x291   :  { %4264 = vmatprep.subr.mxu0 %v4303_v38  ;;  %2912 = vmatprep.mubr.f32.mxu1 %v4303_v38  ;;  %v3368_v26 = vsub.f32 %v5891_v50, %v3367_v8 }
 0x292   :  { %2867 = vmatpush1.msra.mxu1 %v2866_v46 }
 0x293   :  { %4257 = vmatmul.mubr.f32.vlgmr.msra.gmra.mxu0 %v2356_v25  ;;  %2873 = vmatprep.subr.mxu1 %v2872_v6  ;;  %v3361_v25 = vand.u32 4294901760, %v5886_v52 }
 0x294   :  { %4265 = vmatpush3.msra.mxu0 %v2398_v53  ;;  %4266 = vmatprep.mubr.msk.f32.mxu0 %vm4304_vm0, %v4303_v38  ;;  %v2744_v53 = vld [vmem:[%s5994_s4 + $0x38] sm:$0xff] }
 0x295   :  { %2777 = vmatprep.subr.mxu0 %v5808_v30  ;;  %2879 = vmatpush1.msra.mxu1 %v2878_v10  ;;  %v5868_v22 = vand.u32 4294901760, %v2744_v53  ;;  %v3362_v28 = vsub.f32 %v5886_v52, %v3361_v25 }
 0x296   :  { %3030 = vmatprep.subr.mxu1 %v5808_v30 }
 0x297   :  { %4267 = vmatmul.mubr.f32.vlgmr.msra.gmra.mxu0 %v2355_v31  ;;  %v5878_v37 = vsub.f32 %v2744_v53, %v5868_v22  ;;  %v3355_v31 = vand.u32 4294901760, %v5883_v15  ;;  %v3363_v46 = vand.u32 4294901760, %v3362_v28 }
 0x298   :  { %2816 = vmatprep.mubr.f32.mxu0 %v4303_v38  ;;  %2779 = vmatpush1.msra.mxu0 %v5813_v55 }
 0x299   :  { %2781 = vmatprep.subr.mxu0 %v5821_v63  ;;  %v3349_v24 = vand.u32 4294901760, %v5878_v37  ;;  %v3356_v42 = vsub.f32 %v5883_v15, %v3355_v31 }
 0x29a   :  { %2783 = vmatpush1.msra.mxu0 %v5830_v0 }
 0x29b   :  { %2950 = vmatprep.subr.mxu0 %v5819_v16  ;;  %v3350_v60 = vsub.f32 %v5878_v37, %v3349_v24  ;;  %v3357_v58 = vand.u32 4294901760, %v3356_v42 }
 0x29d   :  { %v3351_v36 = vand.u32 4294901760, %v3350_v60 }
 0x347   :  { %v2437_v4 = vpop.f32.mrf.mxu1 }
 0x349   :  { %v4253_v44 = vpop.f32.mrf.mxu1 }
 0x34b   :  { %v2585_v13 = vpop.f32.mrf.mxu1 }
 0x34d   :  { %v4263_v59 = vpop.f32.mrf.mxu1 }
 0x34f   :  { %v2361_v43 = vpop.f32.mrf.mxu0  ;;  %v2731_v35 = vpop.f32.mrf.mxu1 }
 0x350   :  { %v2438_v23 = vadd.f32 %v2437_v4, %v2361_v43 }
 0x351   :  { %v4248_v61 = vpop.f32.mrf.mxu0  ;;  %v4273_v2 = vpop.f32.mrf.mxu1 }
 0x353   :  { %v2511_v56 = vpop.f32.mrf.mxu0 }
 0x354   :  { %v2512_v7 = vadd.f32 %v2511_v56, %v2438_v23  ;;  %v4277_v23 = vld [vmem:[%s5990_s0] sm:$0xff] }
 0x355   :  { %v4258_v54 = vpop.f32.mrf.mxu0 }
 0x356   :  { %v2586_v20 = vadd.f32 %v2585_v13, %v2512_v7 }
 0x357   :  { %v2659_v18 = vpop.f32.mrf.mxu0 }
 0x358   :  { %v2660_v34 = vadd.f32 %v2659_v18, %v2586_v20  ;;  %v4278_v20 = vld [vmem:[%s5990_s0 + $0x8] sm:$0xff] }
 0x359   :  { %v4268_v39 = vpop.f32.mrf.mxu0 }
 0x35a   :  { %v2732_v17 = vadd.f32 %v2731_v35, %v2660_v34 }
 0x35c   :  { %v2735_v32 = vmax.f32 %v2732_v17, 0.0 }
 0x35e   :  { %v2736_v27 = vadd.f32 1.0, %v2735_v32 }
 0x360   :  { %v2746_v19 = vsel %vm1816_vm1, %v2736_v27, 0 }
 0x361   :  { %v5893_v62 = vand.u32 4294901760, %v2746_v19 }
 0x363   :  { %v5898_v14 = vsub.f32 %v2746_v19, %v5893_v62  ;;  %2914 = vmatmul.mubr.f32.vlgmr.msra.gmra.mxu1 %v5893_v62 }
 0x364   :  { %3032 = vmatpush1.msra.mxu1 %v5813_v55  ;;  %3069 = vmatprep.mubr.f32.mxu1 %v4303_v38 }
 0x365   :  { %3034 = vmatprep.subr.mxu1 %v5821_v63  ;;  %v2819_v51 = vand.u32 4294901760, %v5898_v14 }
 0x366   :  { %3036 = vmatpush1.msra.mxu1 %v5830_v0 }
 0x367   :  { %3073 = vmatmul.mubr.f32.vlgmr.msra.gmra.mxu1 %v2819_v51  ;;  %3192 = vmatprep.subr.mxu1 %v5808_v30  ;;  %v2820_v21 = vsub.f32 %v5898_v14, %v2819_v51  ;;  %v3369_v30 = vand.u32 4294901760, %v3368_v26 }
 0x368   :  { %3194 = vmatpush1.msra.mxu1 %v5813_v55  ;;  %3231 = vmatprep.mubr.f32.mxu1 %v4303_v38 }
 0x369   :  { %3196 = vmatprep.subr.mxu1 %v5821_v63  ;;  %v2821_v45 = vand.u32 4294901760, %v2820_v21 }
 0x36a   :  { %3198 = vmatpush1.msra.mxu1 %v5830_v0 }
 0x36b   :  { %2822 = vmatmul.mubr.f32.vlgmr.msra.gmra.mxu0 %v2821_v45  ;;  %3233 = vmatmul.mubr.f32.vlgmr.msra.gmra.mxu1 %v5893_v62 }
 0x36c   :  { %2953 = vmatpush1.msra.mxu0 %v5828_v49  ;;  %3352 = vmatprep.subr.mxu1 %v3351_v36 }
 0x36d   :  { %2956 = vmatprep.subr.mxu0 %v5835_v40  ;;  %3358 = vmatpush1.msra.mxu1 %v3357_v58 }
 0x36e   :  { %2959 = vmatpush1.msra.mxu0 %v5840_v9  ;;  %3364 = vmatprep.subr.mxu1 %v3363_v46 }
 0x36f   :  { %2992 = vmatprep.mubr.f32.mxu0 %v4303_v38  ;;  %3110 = vmatprep.subr.mxu0 %v2858_v41 }
 0x370   :  { %3370 = vmatpush1.msra.mxu1 %v3369_v30  ;;  %3403 = vmatprep.mubr.f32.mxu1 %v4303_v38 }
 0x371   :  { %2995 = vmatmul.mubr.f32.vlgmr.msra.gmra.mxu0 %v5898_v14  ;;  %3405 = vmatmul.mubr.f32.vlgmr.msra.gmra.mxu1 %v5893_v62 }
 0x372   :  { %3114 = vmatpush1.msra.mxu0 %v2864_v5  ;;  %3521 = vmatprep.subr.mxu1 %v5868_v22 }
 0x373   :  { %3118 = vmatprep.subr.mxu0 %v2870_v57  ;;  %3523 = vmatpush1.msra.mxu1 %v5870_v47 }
 0x374   :  { %3122 = vmatpush1.msra.mxu0 %v2876_v12  ;;  %3525 = vmatprep.subr.mxu1 %v5875_v1 }
 0x375   :  { %3155 = vmatprep.mubr.f32.mxu0 %v4303_v38  ;;  %3268 = vmatprep.subr.mxu0 %v5868_v22 }
 0x376   :  { %3527 = vmatpush1.msra.mxu1 %v5880_v29  ;;  %3560 = vmatprep.mubr.f32.mxu1 %v4303_v38 }
 0x377   :  { %3157 = vmatmul.mubr.f32.vlgmr.msra.gmra.mxu0 %v5893_v62  ;;  %3564 = vmatmul.mubr.f32.vlgmr.msra.gmra.mxu1 %v2819_v51 }
 0x378   :  { %3270 = vmatpush1.msra.mxu0 %v5870_v47  ;;  %3683 = vmatprep.subr.mxu1 %v5868_v22 }
 0x379   :  { %3272 = vmatprep.subr.mxu0 %v5875_v1  ;;  %3685 = vmatpush1.msra.mxu1 %v5870_v47 }
 0x37a   :  { %3274 = vmatpush1.msra.mxu0 %v5880_v29  ;;  %3687 = vmatprep.subr.mxu1 %v5875_v1 }
 0x37b   :  { %3307 = vmatprep.mubr.f32.mxu0 %v4303_v38  ;;  %3441 = vmatprep.subr.mxu0 %v5878_v37 }
 0x37c   :  { %3689 = vmatpush1.msra.mxu1 %v5880_v29  ;;  %3722 = vmatprep.mubr.f32.mxu1 %v4303_v38 }
 0x37d   :  { %3313 = vmatmul.mubr.f32.vlgmr.msra.gmra.mxu0 %v2821_v45  ;;  %3724 = vmatmul.mubr.f32.vlgmr.msra.gmra.mxu1 %v5893_v62 }
 0x37e   :  { %3444 = vmatpush1.msra.mxu0 %v5883_v15  ;;  %3483 = vmatprep.mubr.f32.mxu0 %v4303_v38 }
 0x37f   :  { %3447 = vmatprep.subr.mxu0 %v5886_v52 }
 0x380   :  { %3450 = vmatpush1.msra.mxu0 %v5891_v50  ;;  %v4279_v50 = vld [vmem:[%s5990_s0 + $0x10] sm:$0xff] }
 0x381   :  { %3601 = vmatprep.subr.mxu0 %v3349_v24  ;;  %3486 = vmatmul.mubr.f32.vlgmr.msra.gmra.mxu0 %v5898_v14 }
 0x382   :  { %3605 = vmatpush1.msra.mxu0 %v3355_v31  ;;  %3646 = vmatprep.mubr.f32.mxu0 %v4303_v38 }
 0x383   :  { %3609 = vmatprep.subr.mxu0 %v3361_v25  ;;  %v4280_v25 = vld [vmem:[%s5990_s0 + $0x18] sm:$0xff] }
 0x384   :  { %3613 = vmatpush1.msra.mxu0 %v3367_v8 }
 0x385   :  { %3648 = vmatmul.mubr.f32.vlgmr.msra.gmra.mxu0 %v5893_v62 }
 0x423   :  { %v2915_v55 = vpop.f32.mrf.mxu1 }
 0x425   :  { %v2917_v16 = vpop.f32.mrf.mxu1 }
 0x427   :  { %v3074_v63 = vpop.f32.mrf.mxu1 }
 0x429   :  { %v3076_v49 = vpop.f32.mrf.mxu1 }
 0x42b   :  { %v2823_v0 = vpop.f32.mrf.mxu0  ;;  %v3234_v41 = vpop.f32.mrf.mxu1 }
 0x42c   :  { %v2916_v5 = vadd.f32 %v2915_v55, %v2823_v0 }
 0x42d   :  { %v2825_v40 = vpop.f32.mrf.mxu0  ;;  %v3236_v9 = vpop.f32.mrf.mxu1 }
 0x42e   :  { %v2918_v12 = vadd.f32 %v2917_v16, %v2825_v40 }
 0x431   :  { %v2996_v57 = vpop.f32.mrf.mxu0  ;;  %v3406_v4 = vpop.f32.mrf.mxu1 }
 0x432   :  { %v2997_v38 = vadd.f32 %v2996_v57, %v2916_v5 }
 0x433   :  { %v2998_v3 = vpop.f32.mrf.mxu0  ;;  %v3408_v43 = vpop.f32.mrf.mxu1 }
 0x434   :  { %v2999_v6 = vadd.f32 %v2998_v3, %v2918_v12  ;;  %v3075_v10 = vadd.f32 %v3074_v63, %v2997_v38 }
 0x436   :  { %v3077_v44 = vadd.f32 %v3076_v49, %v2999_v6 }
 0x437   :  { %v3158_v13 = vpop.f32.mrf.mxu0  ;;  %v3565_v54 = vpop.f32.mrf.mxu1 }
 0x438   :  { %v3159_v59 = vadd.f32 %v3158_v13, %v3075_v10 }
 0x439   :  { %v3160_v35 = vpop.f32.mrf.mxu0  ;;  %v3567_v34 = vpop.f32.mrf.mxu1 }
 0x43a   :  { %v3235_v61 = vadd.f32 %v3234_v41, %v3159_v59  ;;  %v3161_v2 = vadd.f32 %v3160_v35, %v3077_v44 }
 0x43c   :  { %v3730_v56 = vmul.f32 %v4277_v23, %v3235_v61  ;;  %v3237_v7 = vadd.f32 %v3236_v9, %v3161_v2 }
 0x43d   :  { %v3314_v53 = vpop.f32.mrf.mxu0  ;;  %v3725_v32 = vpop.f32.mrf.mxu1 }
 0x43e   :  { %3734 = vst [vmem:[#allocation2] sm:$0xff] %v3730_v56  ;;  %v3731_v48 = vmul.f32 %v4278_v20, %v3237_v7  ;;  %v3407_v11 = vadd.f32 %v3406_v4, %v3314_v53 }
 0x43f   :  { %v3316_v18 = vpop.f32.mrf.mxu0  ;;  %v3727_v24 = vpop.f32.mrf.mxu1 }
 0x440   :  { %3735 = vst [vmem:[#allocation2 + $0x8] sm:$0xff] %v3731_v48  ;;  %v3409_v39 = vadd.f32 %v3408_v43, %v3316_v18 }
 0x441   :  { %v3487_v22 = vpop.f32.mrf.mxu0 }
 0x442   :  { %v3488_v47 = vadd.f32 %v3487_v22, %v3407_v11 }
 0x443   :  { %v3489_v33 = vpop.f32.mrf.mxu0 }
 0x444   :  { %v3490_v17 = vadd.f32 %v3489_v33, %v3409_v39  ;;  %v3566_v1 = vadd.f32 %v3565_v54, %v3488_v47 }
 0x445   :  { %v3649_v37 = vpop.f32.mrf.mxu0 }
 0x446   :  { %v3650_v29 = vadd.f32 %v3649_v37, %v3566_v1  ;;  %v3568_v15 = vadd.f32 %v3567_v34, %v3490_v17 }
 0x447   :  { %v3651_v27 = vpop.f32.mrf.mxu0 }
 0x448   :  { %v3726_v52 = vadd.f32 %v3725_v32, %v3650_v29  ;;  %v3652_v19 = vadd.f32 %v3651_v27, %v3568_v15 }
 0x44a   :  { %v3732_v62 = vmul.f32 %v4279_v50, %v3726_v52  ;;  %v3728_v31 = vadd.f32 %v3727_v24, %v3652_v19 }
 0x44c   :  { %3736 = vst [vmem:[#allocation2 + $0x10] sm:$0xff] %v3732_v62  ;;  %v3733_v14 = vmul.f32 %v4280_v25, %v3728_v31 }
 0x44e   :  { %3737 = vst [vmem:[#allocation2 + $0x18] sm:$0xff] %v3733_v14 }
 0x44f   :  { %4292 = shalt.err (!%p4289_p4)
}
 0x450   :  { %3747 = dma.vmem_to_hbm [thread:$0]  %s3745_s27, 512, %s5995_s5, [#allocation3]  }
 0x451   :  { %4301 = dma.done.wait [#allocation3], 512  }
 0x452   :  { %4302 = vsyncadd [#allocation3], 4294966784 }
 0x453   :  { %3751 = vsyncpa [#allocation3], 1 }

</bundles_post_ra>
